<compile_context>
chip_gen: v7x
topology: tpu7x:2x2x1
jax: 0.10.0
libtpu: 0.0.40
codegen_flags: <defaults>
</compile_context>

<pallas_src>
import functools

import jax
import jax.numpy as jnp
from jax.experimental import pallas as pl
from jax.experimental.pallas import tpu as pltpu  # noqa: F401  (kept for TPU-specific tuning hooks)


# ----------------------------------------------------------------------------
# Helpers
# ----------------------------------------------------------------------------
def _round_up(v, m):
    return ((v + m - 1) // m) * m


def _pad2(a, rows, cols):
    return jnp.pad(a, ((0, rows - a.shape[0]), (0, cols - a.shape[1])))


# ----------------------------------------------------------------------------
# Fused Pallas kernel: full recurrent MPN loop in one call, everything in VMEM
# ----------------------------------------------------------------------------
def _make_mpn_kernel(steps):
    def kernel(src_col_ref, dst_col_ref, dst_row_ref, x_ref, e_ref,
               ew1s_ref, ew1d_ref, ew1e_ref, eb1_ref, ew2_ref, eb2_ref,
               mw1x_ref, mw1e_ref, mb1_ref, mw2_ref, mb2_ref,
               nw1x_ref, nw1a_ref, nb1_ref, nw2_ref, nb2_ref,
               x_out_ref, e_out_ref):
        n_pad = x_ref.shape[0]
        m_pad = e_ref.shape[0]

        def mm(a, b):
            # bf16 MXU operands, f32 accumulation.
            return jnp.dot(a.astype(jnp.bfloat16), b.astype(jnp.bfloat16),
                           preferred_element_type=jnp.float32)

        # One-hot gather/scatter operators built in-kernel (never hit HBM).
        # gather_src[m, n] = 1 iff src[m] == n ; scatter_dst[n, m] = 1 iff dst[m] == n.
        node_ids = jax.lax.broadcasted_iota(jnp.int32, (m_pad, n_pad), 1)
        gather_src = jnp.where(src_col_ref[...] == node_ids, 1.0, 0.0)
        gather_dst = jnp.where(dst_col_ref[...] == node_ids, 1.0, 0.0)
        node_row_ids = jax.lax.broadcasted_iota(jnp.int32, (n_pad, m_pad), 0)
        scatter_dst = jnp.where(dst_row_ref[...] == node_row_ids, 1.0, 0.0)

        x = x_ref[...]
        e0 = e_ref[...]          # original edge_attr (edge model always consumes this)
        e_mpn = e0

        for _ in range(steps):   # static step count -> unrolled
            # ---------------- node model ----------------
            # message MLP on [x[src], e_mpn]  (concat replaced by split-W1 sum)
            x_src = mm(gather_src, x)                                     # (M, Dn)
            h = jnp.maximum(mm(x_src, mw1x_ref[...]) + mm(e_mpn, mw1e_ref[...])
                            + mb1_ref[...], 0.0)
            msgs = jnp.maximum(mm(h, mw2_ref[...]) + mb2_ref[...], 0.0)   # (M, Dm)
            # scatter-sum into nodes as one-hot^T @ msgs (MXU)
            agg = mm(scatter_dst, msgs)                                   # (N, Dm)
            # node-update MLP on [x, agg]
            hn = jnp.maximum(mm(x, nw1x_ref[...]) + mm(agg, nw1a_ref[...])
                             + nb1_ref[...], 0.0)
            x = jnp.maximum(mm(hn, nw2_ref[...]) + nb2_ref[...], 0.0)     # (N, Dn)

            # ---------------- edge model (uses ORIGINAL edge_attr) ----------------
            xs = mm(gather_src, x)
            xd = mm(gather_dst, x)
            he = jnp.maximum(mm(xs, ew1s_ref[...]) + mm(xd, ew1d_ref[...])
                             + mm(e0, ew1e_ref[...]) + eb1_ref[...], 0.0)
            e_mpn = jnp.maximum(mm(he, ew2_ref[...]) + eb2_ref[...], 0.0)  # (M, De)

        x_out_ref[...] = x
        e_out_ref[...] = e_mpn

    return kernel


# ----------------------------------------------------------------------------
# Wrapper: padding, weight prep, pallas_call
# ----------------------------------------------------------------------------
def mpn_recurrent_forward(x, edge_index, edge_attr, num_nodes, params, steps):
    n, d_node = x.shape
    m, d_edge = edge_attr.shape
    n_pad = _round_up(max(num_nodes, 8), 8)
    m_pad = _round_up(max(m, 8), 8)

    def lanes(d):
        return _round_up(d, 128)

    # Zero-padding of weights is exact: padded rows multiply zero-padded feature
    # columns, padded output columns get 0 weight + 0 bias -> relu(0) = 0.
    def prep_w(w):
        return _pad2(w, lanes(w.shape[0]), lanes(w.shape[1])).astype(jnp.bfloat16)

    def prep_b(b):
        return _pad2(b, 1, lanes(b.shape[1]))  # biases stay f32

    pe, pm_, pn_ = params["edge_mlp"], params["msg_mlp"], params["node_mlp"]

    xp = _pad2(x, n_pad, lanes(d_node))
    ep = _pad2(edge_attr, m_pad, lanes(d_edge))

    src = edge_index[0].astype(jnp.int32)
    dst = edge_index[1].astype(jnp.int32)
    # Sentinel index n_pad matches no node: padded edges gather zero rows and
    # scatter into nothing.
    src_p = jnp.pad(src, (0, m_pad - m), constant_values=n_pad)
    dst_p = jnp.pad(dst, (0, m_pad - m), constant_values=n_pad)
    src_col = src_p.reshape(m_pad, 1)
    dst_col = dst_p.reshape(m_pad, 1)
    dst_row = dst_p.reshape(1, m_pad)

    inputs = (
        src_col, dst_col, dst_row, xp, ep,
        prep_w(pe["w1_src"]), prep_w(pe["w1_dst"]), prep_w(pe["w1_e"]),
        prep_b(pe["b1"]), prep_w(pe["w2"]), prep_b(pe["b2"]),
        prep_w(pm_["w1_x"]), prep_w(pm_["w1_e"]),
        prep_b(pm_["b1"]), prep_w(pm_["w2"]), prep_b(pm_["b2"]),
        prep_w(pn_["w1_x"]), prep_w(pn_["w1_a"]),
        prep_b(pn_["b1"]), prep_w(pn_["w2"]), prep_b(pn_["b2"]),
    )

    # Single grid point: everything (state + weights, <1 MiB here) lives in VMEM
    # for the whole recurrent loop.
    in_specs = [pl.BlockSpec(a.shape, lambda: (0, 0)) for a in inputs]
    out_specs = (
        pl.BlockSpec((n_pad, lanes(d_node)), lambda: (0, 0)),
        pl.BlockSpec((m_pad, lanes(d_edge)), lambda: (0, 0)),
    )

    x_out_p, e_out_p = pl.pallas_call(
        _make_mpn_kernel(steps),
        out_shape=(jax.ShapeDtypeStruct((n_pad, lanes(d_node)), jnp.float32),
                   jax.ShapeDtypeStruct((m_pad, lanes(d_edge)), jnp.float32)),
        grid=(),
        in_specs=in_specs,
        out_specs=out_specs,
    )(*inputs)

    return x_out_p[:num_nodes, :d_node], e_out_p[:m, :d_edge]


# ----------------------------------------------------------------------------
# Deterministic parameter construction (split-W1 layout, logical dims)
# ----------------------------------------------------------------------------
def make_params(key, d_node, d_edge, d_msg, hidden):
    def linear(k, din, dout):
        kw, kb = jax.random.split(k)
        w = jax.random.normal(kw, (din, dout), jnp.float32) * 0.1
        b = jax.random.normal(kb, (1, dout), jnp.float32) * 0.01
        return w, b

    ks = jax.random.split(key, 6)
    ew1, eb1 = linear(ks[0], 2 * d_node + d_edge, hidden)   # [x_src | x_dst | e] -> hidden
    ew2, eb2 = linear(ks[1], hidden, d_edge)
    mw1, mb1 = linear(ks[2], d_node + d_edge, hidden)       # [x_src | e] -> hidden
    mw2, mb2 = linear(ks[3], hidden, d_msg)
    nw1, nb1 = linear(ks[4], d_node + d_msg, hidden)        # [x | agg] -> hidden
    nw2, nb2 = linear(ks[5], hidden, d_node)
    return {
        "edge_mlp": {
            "w1_src": ew1[:d_node], "w1_dst": ew1[d_node:2 * d_node],
            "w1_e": ew1[2 * d_node:], "b1": eb1, "w2": ew2, "b2": eb2,
        },
        "msg_mlp": {
            "w1_x": mw1[:d_node], "w1_e": mw1[d_node:], "b1": mb1,
            "w2": mw2, "b2": mb2,
        },
        "node_mlp": {
            "w1_x": nw1[:d_node], "w1_a": nw1[d_node:], "b1": nb1,
            "w2": nw2, "b2": nb2,
        },
    }


# ----------------------------------------------------------------------------
# Main
# ----------------------------------------------------------------------------
if __name__ == "__main__":
    N_NODES = 16      # number of graph nodes
    N_EDGES = 32      # number of edges
    D_NODE = 32       # node feature dim
    D_EDGE = 16       # edge feature dim
    D_MSG = 32        # message dim
    HIDDEN = 32       # MLP hidden dim
    STEPS = 2         # recurrent message-passing steps

    key = jax.random.PRNGKey(0)
    kx, ke, ki, kp = jax.random.split(key, 4)

    x = jax.random.normal(kx, (N_NODES, D_NODE), jnp.float32)
    edge_attr = jax.random.normal(ke, (N_EDGES, D_EDGE), jnp.float32)
    edge_index = jax.random.randint(ki, (2, N_EDGES), 0, N_NODES, dtype=jnp.int32)

    params = make_params(kp, D_NODE, D_EDGE, D_MSG, HIDDEN)

    fwd = jax.jit(functools.partial(
        mpn_recurrent_forward, num_nodes=N_NODES, params=params, steps=STEPS))
    x_out, edge_out = fwd(x, edge_index, edge_attr)
    jax.block_until_ready((x_out, edge_out))

    assert x_out.shape == (N_NODES, D_NODE)
    assert edge_out.shape == (N_EDGES, D_EDGE)
    assert bool(jnp.all(jnp.isfinite(x_out))) and bool(jnp.all(jnp.isfinite(edge_out)))
    print("KERNEL_OK")
</pallas_src>

<mosaic_0001>
module attributes {stable_mosaic.version = 11 : i64} {
  func.func @kernel(%arg0: memref<32x1xi32, #tpu.memory_space<vmem>>, %arg1: memref<32x1xi32, #tpu.memory_space<vmem>>, %arg2: memref<1x32xi32, #tpu.memory_space<vmem>>, %arg3: memref<16x128xf32, #tpu.memory_space<vmem>>, %arg4: memref<32x128xf32, #tpu.memory_space<vmem>>, %arg5: memref<128x128xbf16, #tpu.memory_space<vmem>>, %arg6: memref<128x128xbf16, #tpu.memory_space<vmem>>, %arg7: memref<128x128xbf16, #tpu.memory_space<vmem>>, %arg8: memref<1x128xf32, #tpu.memory_space<vmem>>, %arg9: memref<128x128xbf16, #tpu.memory_space<vmem>>, %arg10: memref<1x128xf32, #tpu.memory_space<vmem>>, %arg11: memref<128x128xbf16, #tpu.memory_space<vmem>>, %arg12: memref<128x128xbf16, #tpu.memory_space<vmem>>, %arg13: memref<1x128xf32, #tpu.memory_space<vmem>>, %arg14: memref<128x128xbf16, #tpu.memory_space<vmem>>, %arg15: memref<1x128xf32, #tpu.memory_space<vmem>>, %arg16: memref<128x128xbf16, #tpu.memory_space<vmem>>, %arg17: memref<128x128xbf16, #tpu.memory_space<vmem>>, %arg18: memref<1x128xf32, #tpu.memory_space<vmem>>, %arg19: memref<128x128xbf16, #tpu.memory_space<vmem>>, %arg20: memref<1x128xf32, #tpu.memory_space<vmem>>, %arg21: memref<16x128xf32, #tpu.memory_space<vmem>>, %arg22: memref<32x128xf32, #tpu.memory_space<vmem>>) attributes {dimension_semantics = [], scalar_prefetch = 0 : i64, scratch_operands = 0 : i64, tpu.core_type = #tpu.core_type<tc>} {
    %0 = tpu.iota {dimensions = array<i32: 1>} : vector<32x16xi32>
    %c0 = arith.constant 0 : index
    %c0_0 = arith.constant 0 : index
    %1 = vector.load %arg0[%c0, %c0_0] : memref<32x1xi32, #tpu.memory_space<vmem>>, vector<32x1xi32>
    %2 = vector.broadcast %1 : vector<32x1xi32> to vector<32x16xi32>
    %3 = arith.cmpi eq, %2, %0 : vector<32x16xi32>
    %cst = arith.constant 1.000000e+00 : f32
    %cst_1 = arith.constant 0.000000e+00 : f32
    %4 = vector.broadcast %cst : f32 to vector<32x16xf32>
    %5 = vector.broadcast %cst_1 : f32 to vector<32x16xf32>
    %6 = arith.select %3, %4, %5 : vector<32x16xi1>, vector<32x16xf32>
    %c0_2 = arith.constant 0 : index
    %c0_3 = arith.constant 0 : index
    %7 = vector.load %arg1[%c0_2, %c0_3] : memref<32x1xi32, #tpu.memory_space<vmem>>, vector<32x1xi32>
    %8 = vector.broadcast %7 : vector<32x1xi32> to vector<32x16xi32>
    %9 = arith.cmpi eq, %8, %0 : vector<32x16xi32>
    %cst_4 = arith.constant 1.000000e+00 : f32
    %cst_5 = arith.constant 0.000000e+00 : f32
    %10 = vector.broadcast %cst_4 : f32 to vector<32x16xf32>
    %11 = vector.broadcast %cst_5 : f32 to vector<32x16xf32>
    %12 = arith.select %9, %10, %11 : vector<32x16xi1>, vector<32x16xf32>
    %13 = tpu.iota {dimensions = array<i32: 0>} : vector<16x32xi32>
    %c0_6 = arith.constant 0 : index
    %c0_7 = arith.constant 0 : index
    %14 = vector.load %arg2[%c0_6, %c0_7] : memref<1x32xi32, #tpu.memory_space<vmem>>, vector<1x32xi32>
    %15 = vector.broadcast %14 : vector<1x32xi32> to vector<16x32xi32>
    %16 = arith.cmpi eq, %15, %13 : vector<16x32xi32>
    %cst_8 = arith.constant 1.000000e+00 : f32
    %cst_9 = arith.constant 0.000000e+00 : f32
    %17 = vector.broadcast %cst_8 : f32 to vector<16x32xf32>
    %18 = vector.broadcast %cst_9 : f32 to vector<16x32xf32>
    %19 = arith.select %16, %17, %18 : vector<16x32xi1>, vector<16x32xf32>
    %c0_10 = arith.constant 0 : index
    %c0_11 = arith.constant 0 : index
    %20 = vector.load %arg3[%c0_10, %c0_11] : memref<16x128xf32, #tpu.memory_space<vmem>>, vector<16x128xf32>
    %c0_12 = arith.constant 0 : index
    %c0_13 = arith.constant 0 : index
    %21 = vector.load %arg4[%c0_12, %c0_13] : memref<32x128xf32, #tpu.memory_space<vmem>>, vector<32x128xf32>
    %22 = arith.truncf %6 : vector<32x16xf32> to vector<32x16xbf16>
    %23 = arith.truncf %20 : vector<16x128xf32> to vector<16x128xbf16>
    %cst_14 = arith.constant dense<0.000000e+00> : vector<32x128xf32>
    %24 = tpu.matmul %22, %23, %cst_14 {dimension_numbers = #tpu.dot_dimension_numbers<[1], [0], [0], [1], [0, 0, 1, 1], [], []>} : vector<32x16xbf16>, vector<16x128xbf16>, vector<32x128xf32> -> vector<32x128xf32>
    %c0_15 = arith.constant 0 : index
    %c0_16 = arith.constant 0 : index
    %25 = vector.load %arg11[%c0_15, %c0_16] : memref<128x128xbf16, #tpu.memory_space<vmem>>, vector<128x128xbf16>
    %26 = arith.truncf %24 : vector<32x128xf32> to vector<32x128xbf16>
    %cst_17 = arith.constant dense<0.000000e+00> : vector<32x128xf32>
    %27 = tpu.matmul %26, %25, %cst_17 {dimension_numbers = #tpu.dot_dimension_numbers<[1], [0], [0], [1], [0, 0, 1, 1], [], []>} : vector<32x128xbf16>, vector<128x128xbf16>, vector<32x128xf32> -> vector<32x128xf32>
    %c0_18 = arith.constant 0 : index
    %c0_19 = arith.constant 0 : index
    %28 = vector.load %arg12[%c0_18, %c0_19] : memref<128x128xbf16, #tpu.memory_space<vmem>>, vector<128x128xbf16>
    %29 = arith.truncf %21 : vector<32x128xf32> to vector<32x128xbf16>
    %cst_20 = arith.constant dense<0.000000e+00> : vector<32x128xf32>
    %30 = tpu.matmul %29, %28, %cst_20 {dimension_numbers = #tpu.dot_dimension_numbers<[1], [0], [0], [1], [0, 0, 1, 1], [], []>} : vector<32x128xbf16>, vector<128x128xbf16>, vector<32x128xf32> -> vector<32x128xf32>
    %31 = arith.addf %27, %30 : vector<32x128xf32>
    %c0_21 = arith.constant 0 : index
    %c0_22 = arith.constant 0 : index
    %32 = vector.load %arg13[%c0_21, %c0_22] : memref<1x128xf32, #tpu.memory_space<vmem>>, vector<1x128xf32>
    %33 = vector.broadcast %32 : vector<1x128xf32> to vector<32x128xf32>
    %34 = arith.addf %31, %33 : vector<32x128xf32>
    %cst_23 = arith.constant 0.000000e+00 : f32
    %35 = vector.broadcast %cst_23 : f32 to vector<32x128xf32>
    %36 = arith.maximumf %34, %35 : vector<32x128xf32>
    %c0_24 = arith.constant 0 : index
    %c0_25 = arith.constant 0 : index
    %37 = vector.load %arg14[%c0_24, %c0_25] : memref<128x128xbf16, #tpu.memory_space<vmem>>, vector<128x128xbf16>
    %38 = arith.truncf %36 : vector<32x128xf32> to vector<32x128xbf16>
    %cst_26 = arith.constant dense<0.000000e+00> : vector<32x128xf32>
    %39 = tpu.matmul %38, %37, %cst_26 {dimension_numbers = #tpu.dot_dimension_numbers<[1], [0], [0], [1], [0, 0, 1, 1], [], []>} : vector<32x128xbf16>, vector<128x128xbf16>, vector<32x128xf32> -> vector<32x128xf32>
    %c0_27 = arith.constant 0 : index
    %c0_28 = arith.constant 0 : index
    %40 = vector.load %arg15[%c0_27, %c0_28] : memref<1x128xf32, #tpu.memory_space<vmem>>, vector<1x128xf32>
    %41 = vector.broadcast %40 : vector<1x128xf32> to vector<32x128xf32>
    %42 = arith.addf %39, %41 : vector<32x128xf32>
    %cst_29 = arith.constant 0.000000e+00 : f32
    %43 = vector.broadcast %cst_29 : f32 to vector<32x128xf32>
    %44 = arith.maximumf %42, %43 : vector<32x128xf32>
    %45 = arith.truncf %19 : vector<16x32xf32> to vector<16x32xbf16>
    %46 = arith.truncf %44 : vector<32x128xf32> to vector<32x128xbf16>
    %cst_30 = arith.constant dense<0.000000e+00> : vector<16x128xf32>
    %47 = tpu.matmul %45, %46, %cst_30 {dimension_numbers = #tpu.dot_dimension_numbers<[1], [0], [0], [1], [0, 0, 1, 1], [], []>} : vector<16x32xbf16>, vector<32x128xbf16>, vector<16x128xf32> -> vector<16x128xf32>
    %c0_31 = arith.constant 0 : index
    %c0_32 = arith.constant 0 : index
    %48 = vector.load %arg16[%c0_31, %c0_32] : memref<128x128xbf16, #tpu.memory_space<vmem>>, vector<128x128xbf16>
    %49 = arith.truncf %20 : vector<16x128xf32> to vector<16x128xbf16>
    %cst_33 = arith.constant dense<0.000000e+00> : vector<16x128xf32>
    %50 = tpu.matmul %49, %48, %cst_33 {dimension_numbers = #tpu.dot_dimension_numbers<[1], [0], [0], [1], [0, 0, 1, 1], [], []>} : vector<16x128xbf16>, vector<128x128xbf16>, vector<16x128xf32> -> vector<16x128xf32>
    %c0_34 = arith.constant 0 : index
    %c0_35 = arith.constant 0 : index
    %51 = vector.load %arg17[%c0_34, %c0_35] : memref<128x128xbf16, #tpu.memory_space<vmem>>, vector<128x128xbf16>
    %52 = arith.truncf %47 : vector<16x128xf32> to vector<16x128xbf16>
    %cst_36 = arith.constant dense<0.000000e+00> : vector<16x128xf32>
    %53 = tpu.matmul %52, %51, %cst_36 {dimension_numbers = #tpu.dot_dimension_numbers<[1], [0], [0], [1], [0, 0, 1, 1], [], []>} : vector<16x128xbf16>, vector<128x128xbf16>, vector<16x128xf32> -> vector<16x128xf32>
    %54 = arith.addf %50, %53 : vector<16x128xf32>
    %c0_37 = arith.constant 0 : index
    %c0_38 = arith.constant 0 : index
    %55 = vector.load %arg18[%c0_37, %c0_38] : memref<1x128xf32, #tpu.memory_space<vmem>>, vector<1x128xf32>
    %56 = vector.broadcast %55 : vector<1x128xf32> to vector<16x128xf32>
    %57 = arith.addf %54, %56 : vector<16x128xf32>
    %cst_39 = arith.constant 0.000000e+00 : f32
    %58 = vector.broadcast %cst_39 : f32 to vector<16x128xf32>
    %59 = arith.maximumf %57, %58 : vector<16x128xf32>
    %c0_40 = arith.constant 0 : index
    %c0_41 = arith.constant 0 : index
    %60 = vector.load %arg19[%c0_40, %c0_41] : memref<128x128xbf16, #tpu.memory_space<vmem>>, vector<128x128xbf16>
    %61 = arith.truncf %59 : vector<16x128xf32> to vector<16x128xbf16>
    %cst_42 = arith.constant dense<0.000000e+00> : vector<16x128xf32>
    %62 = tpu.matmul %61, %60, %cst_42 {dimension_numbers = #tpu.dot_dimension_numbers<[1], [0], [0], [1], [0, 0, 1, 1], [], []>} : vector<16x128xbf16>, vector<128x128xbf16>, vector<16x128xf32> -> vector<16x128xf32>
    %c0_43 = arith.constant 0 : index
    %c0_44 = arith.constant 0 : index
    %63 = vector.load %arg20[%c0_43, %c0_44] : memref<1x128xf32, #tpu.memory_space<vmem>>, vector<1x128xf32>
    %64 = vector.broadcast %63 : vector<1x128xf32> to vector<16x128xf32>
    %65 = arith.addf %62, %64 : vector<16x128xf32>
    %cst_45 = arith.constant 0.000000e+00 : f32
    %66 = vector.broadcast %cst_45 : f32 to vector<16x128xf32>
    %67 = arith.maximumf %65, %66 : vector<16x128xf32>
    %68 = arith.truncf %6 : vector<32x16xf32> to vector<32x16xbf16>
    %69 = arith.truncf %67 : vector<16x128xf32> to vector<16x128xbf16>
    %cst_46 = arith.constant dense<0.000000e+00> : vector<32x128xf32>
    %70 = tpu.matmul %68, %69, %cst_46 {dimension_numbers = #tpu.dot_dimension_numbers<[1], [0], [0], [1], [0, 0, 1, 1], [], []>} : vector<32x16xbf16>, vector<16x128xbf16>, vector<32x128xf32> -> vector<32x128xf32>
    %71 = arith.truncf %12 : vector<32x16xf32> to vector<32x16xbf16>
    %72 = arith.truncf %67 : vector<16x128xf32> to vector<16x128xbf16>
    %cst_47 = arith.constant dense<0.000000e+00> : vector<32x128xf32>
    %73 = tpu.matmul %71, %72, %cst_47 {dimension_numbers = #tpu.dot_dimension_numbers<[1], [0], [0], [1], [0, 0, 1, 1], [], []>} : vector<32x16xbf16>, vector<16x128xbf16>, vector<32x128xf32> -> vector<32x128xf32>
    %c0_48 = arith.constant 0 : index
    %c0_49 = arith.constant 0 : index
    %74 = vector.load %arg5[%c0_48, %c0_49] : memref<128x128xbf16, #tpu.memory_space<vmem>>, vector<128x128xbf16>
    %75 = arith.truncf %70 : vector<32x128xf32> to vector<32x128xbf16>
    %cst_50 = arith.constant dense<0.000000e+00> : vector<32x128xf32>
    %76 = tpu.matmul %75, %74, %cst_50 {dimension_numbers = #tpu.dot_dimension_numbers<[1], [0], [0], [1], [0, 0, 1, 1], [], []>} : vector<32x128xbf16>, vector<128x128xbf16>, vector<32x128xf32> -> vector<32x128xf32>
    %c0_51 = arith.constant 0 : index
    %c0_52 = arith.constant 0 : index
    %77 = vector.load %arg6[%c0_51, %c0_52] : memref<128x128xbf16, #tpu.memory_space<vmem>>, vector<128x128xbf16>
    %78 = arith.truncf %73 : vector<32x128xf32> to vector<32x128xbf16>
    %cst_53 = arith.constant dense<0.000000e+00> : vector<32x128xf32>
    %79 = tpu.matmul %78, %77, %cst_53 {dimension_numbers = #tpu.dot_dimension_numbers<[1], [0], [0], [1], [0, 0, 1, 1], [], []>} : vector<32x128xbf16>, vector<128x128xbf16>, vector<32x128xf32> -> vector<32x128xf32>
    %80 = arith.addf %76, %79 : vector<32x128xf32>
    %c0_54 = arith.constant 0 : index
    %c0_55 = arith.constant 0 : index
    %81 = vector.load %arg7[%c0_54, %c0_55] : memref<128x128xbf16, #tpu.memory_space<vmem>>, vector<128x128xbf16>
    %82 = arith.truncf %21 : vector<32x128xf32> to vector<32x128xbf16>
    %cst_56 = arith.constant dense<0.000000e+00> : vector<32x128xf32>
    %83 = tpu.matmul %82, %81, %cst_56 {dimension_numbers = #tpu.dot_dimension_numbers<[1], [0], [0], [1], [0, 0, 1, 1], [], []>} : vector<32x128xbf16>, vector<128x128xbf16>, vector<32x128xf32> -> vector<32x128xf32>
    %84 = arith.addf %80, %83 : vector<32x128xf32>
    %c0_57 = arith.constant 0 : index
    %c0_58 = arith.constant 0 : index
    %85 = vector.load %arg8[%c0_57, %c0_58] : memref<1x128xf32, #tpu.memory_space<vmem>>, vector<1x128xf32>
    %86 = vector.broadcast %85 : vector<1x128xf32> to vector<32x128xf32>
    %87 = arith.addf %84, %86 : vector<32x128xf32>
    %cst_59 = arith.constant 0.000000e+00 : f32
    %88 = vector.broadcast %cst_59 : f32 to vector<32x128xf32>
    %89 = arith.maximumf %87, %88 : vector<32x128xf32>
    %c0_60 = arith.constant 0 : index
    %c0_61 = arith.constant 0 : index
    %90 = vector.load %arg9[%c0_60, %c0_61] : memref<128x128xbf16, #tpu.memory_space<vmem>>, vector<128x128xbf16>
    %91 = arith.truncf %89 : vector<32x128xf32> to vector<32x128xbf16>
    %cst_62 = arith.constant dense<0.000000e+00> : vector<32x128xf32>
    %92 = tpu.matmul %91, %90, %cst_62 {dimension_numbers = #tpu.dot_dimension_numbers<[1], [0], [0], [1], [0, 0, 1, 1], [], []>} : vector<32x128xbf16>, vector<128x128xbf16>, vector<32x128xf32> -> vector<32x128xf32>
    %c0_63 = arith.constant 0 : index
    %c0_64 = arith.constant 0 : index
    %93 = vector.load %arg10[%c0_63, %c0_64] : memref<1x128xf32, #tpu.memory_space<vmem>>, vector<1x128xf32>
    %94 = vector.broadcast %93 : vector<1x128xf32> to vector<32x128xf32>
    %95 = arith.addf %92, %94 : vector<32x128xf32>
    %cst_65 = arith.constant 0.000000e+00 : f32
    %96 = vector.broadcast %cst_65 : f32 to vector<32x128xf32>
    %97 = arith.maximumf %95, %96 : vector<32x128xf32>
    %98 = arith.truncf %6 : vector<32x16xf32> to vector<32x16xbf16>
    %99 = arith.truncf %67 : vector<16x128xf32> to vector<16x128xbf16>
    %cst_66 = arith.constant dense<0.000000e+00> : vector<32x128xf32>
    %100 = tpu.matmul %98, %99, %cst_66 {dimension_numbers = #tpu.dot_dimension_numbers<[1], [0], [0], [1], [0, 0, 1, 1], [], []>} : vector<32x16xbf16>, vector<16x128xbf16>, vector<32x128xf32> -> vector<32x128xf32>
    %c0_67 = arith.constant 0 : index
    %c0_68 = arith.constant 0 : index
    %101 = vector.load %arg11[%c0_67, %c0_68] : memref<128x128xbf16, #tpu.memory_space<vmem>>, vector<128x128xbf16>
    %102 = arith.truncf %100 : vector<32x128xf32> to vector<32x128xbf16>
    %cst_69 = arith.constant dense<0.000000e+00> : vector<32x128xf32>
    %103 = tpu.matmul %102, %101, %cst_69 {dimension_numbers = #tpu.dot_dimension_numbers<[1], [0], [0], [1], [0, 0, 1, 1], [], []>} : vector<32x128xbf16>, vector<128x128xbf16>, vector<32x128xf32> -> vector<32x128xf32>
    %c0_70 = arith.constant 0 : index
    %c0_71 = arith.constant 0 : index
    %104 = vector.load %arg12[%c0_70, %c0_71] : memref<128x128xbf16, #tpu.memory_space<vmem>>, vector<128x128xbf16>
    %105 = arith.truncf %97 : vector<32x128xf32> to vector<32x128xbf16>
    %cst_72 = arith.constant dense<0.000000e+00> : vector<32x128xf32>
    %106 = tpu.matmul %105, %104, %cst_72 {dimension_numbers = #tpu.dot_dimension_numbers<[1], [0], [0], [1], [0, 0, 1, 1], [], []>} : vector<32x128xbf16>, vector<128x128xbf16>, vector<32x128xf32> -> vector<32x128xf32>
    %107 = arith.addf %103, %106 : vector<32x128xf32>
    %c0_73 = arith.constant 0 : index
    %c0_74 = arith.constant 0 : index
    %108 = vector.load %arg13[%c0_73, %c0_74] : memref<1x128xf32, #tpu.memory_space<vmem>>, vector<1x128xf32>
    %109 = vector.broadcast %108 : vector<1x128xf32> to vector<32x128xf32>
    %110 = arith.addf %107, %109 : vector<32x128xf32>
    %cst_75 = arith.constant 0.000000e+00 : f32
    %111 = vector.broadcast %cst_75 : f32 to vector<32x128xf32>
    %112 = arith.maximumf %110, %111 : vector<32x128xf32>
    %c0_76 = arith.constant 0 : index
    %c0_77 = arith.constant 0 : index
    %113 = vector.load %arg14[%c0_76, %c0_77] : memref<128x128xbf16, #tpu.memory_space<vmem>>, vector<128x128xbf16>
    %114 = arith.truncf %112 : vector<32x128xf32> to vector<32x128xbf16>
    %cst_78 = arith.constant dense<0.000000e+00> : vector<32x128xf32>
    %115 = tpu.matmul %114, %113, %cst_78 {dimension_numbers = #tpu.dot_dimension_numbers<[1], [0], [0], [1], [0, 0, 1, 1], [], []>} : vector<32x128xbf16>, vector<128x128xbf16>, vector<32x128xf32> -> vector<32x128xf32>
    %c0_79 = arith.constant 0 : index
    %c0_80 = arith.constant 0 : index
    %116 = vector.load %arg15[%c0_79, %c0_80] : memref<1x128xf32, #tpu.memory_space<vmem>>, vector<1x128xf32>
    %117 = vector.broadcast %116 : vector<1x128xf32> to vector<32x128xf32>
    %118 = arith.addf %115, %117 : vector<32x128xf32>
    %cst_81 = arith.constant 0.000000e+00 : f32
    %119 = vector.broadcast %cst_81 : f32 to vector<32x128xf32>
    %120 = arith.maximumf %118, %119 : vector<32x128xf32>
    %121 = arith.truncf %19 : vector<16x32xf32> to vector<16x32xbf16>
    %122 = arith.truncf %120 : vector<32x128xf32> to vector<32x128xbf16>
    %cst_82 = arith.constant dense<0.000000e+00> : vector<16x128xf32>
    %123 = tpu.matmul %121, %122, %cst_82 {dimension_numbers = #tpu.dot_dimension_numbers<[1], [0], [0], [1], [0, 0, 1, 1], [], []>} : vector<16x32xbf16>, vector<32x128xbf16>, vector<16x128xf32> -> vector<16x128xf32>
    %c0_83 = arith.constant 0 : index
    %c0_84 = arith.constant 0 : index
    %124 = vector.load %arg16[%c0_83, %c0_84] : memref<128x128xbf16, #tpu.memory_space<vmem>>, vector<128x128xbf16>
    %125 = arith.truncf %67 : vector<16x128xf32> to vector<16x128xbf16>
    %cst_85 = arith.constant dense<0.000000e+00> : vector<16x128xf32>
    %126 = tpu.matmul %125, %124, %cst_85 {dimension_numbers = #tpu.dot_dimension_numbers<[1], [0], [0], [1], [0, 0, 1, 1], [], []>} : vector<16x128xbf16>, vector<128x128xbf16>, vector<16x128xf32> -> vector<16x128xf32>
    %c0_86 = arith.constant 0 : index
    %c0_87 = arith.constant 0 : index
    %127 = vector.load %arg17[%c0_86, %c0_87] : memref<128x128xbf16, #tpu.memory_space<vmem>>, vector<128x128xbf16>
    %128 = arith.truncf %123 : vector<16x128xf32> to vector<16x128xbf16>
    %cst_88 = arith.constant dense<0.000000e+00> : vector<16x128xf32>
    %129 = tpu.matmul %128, %127, %cst_88 {dimension_numbers = #tpu.dot_dimension_numbers<[1], [0], [0], [1], [0, 0, 1, 1], [], []>} : vector<16x128xbf16>, vector<128x128xbf16>, vector<16x128xf32> -> vector<16x128xf32>
    %130 = arith.addf %126, %129 : vector<16x128xf32>
    %c0_89 = arith.constant 0 : index
    %c0_90 = arith.constant 0 : index
    %131 = vector.load %arg18[%c0_89, %c0_90] : memref<1x128xf32, #tpu.memory_space<vmem>>, vector<1x128xf32>
    %132 = vector.broadcast %131 : vector<1x128xf32> to vector<16x128xf32>
    %133 = arith.addf %130, %132 : vector<16x128xf32>
    %cst_91 = arith.constant 0.000000e+00 : f32
    %134 = vector.broadcast %cst_91 : f32 to vector<16x128xf32>
    %135 = arith.maximumf %133, %134 : vector<16x128xf32>
    %c0_92 = arith.constant 0 : index
    %c0_93 = arith.constant 0 : index
    %136 = vector.load %arg19[%c0_92, %c0_93] : memref<128x128xbf16, #tpu.memory_space<vmem>>, vector<128x128xbf16>
    %137 = arith.truncf %135 : vector<16x128xf32> to vector<16x128xbf16>
    %cst_94 = arith.constant dense<0.000000e+00> : vector<16x128xf32>
    %138 = tpu.matmul %137, %136, %cst_94 {dimension_numbers = #tpu.dot_dimension_numbers<[1], [0], [0], [1], [0, 0, 1, 1], [], []>} : vector<16x128xbf16>, vector<128x128xbf16>, vector<16x128xf32> -> vector<16x128xf32>
    %c0_95 = arith.constant 0 : index
    %c0_96 = arith.constant 0 : index
    %139 = vector.load %arg20[%c0_95, %c0_96] : memref<1x128xf32, #tpu.memory_space<vmem>>, vector<1x128xf32>
    %140 = vector.broadcast %139 : vector<1x128xf32> to vector<16x128xf32>
    %141 = arith.addf %138, %140 : vector<16x128xf32>
    %cst_97 = arith.constant 0.000000e+00 : f32
    %142 = vector.broadcast %cst_97 : f32 to vector<16x128xf32>
    %143 = arith.maximumf %141, %142 : vector<16x128xf32>
    %144 = arith.truncf %6 : vector<32x16xf32> to vector<32x16xbf16>
    %145 = arith.truncf %143 : vector<16x128xf32> to vector<16x128xbf16>
    %cst_98 = arith.constant dense<0.000000e+00> : vector<32x128xf32>
    %146 = tpu.matmul %144, %145, %cst_98 {dimension_numbers = #tpu.dot_dimension_numbers<[1], [0], [0], [1], [0, 0, 1, 1], [], []>} : vector<32x16xbf16>, vector<16x128xbf16>, vector<32x128xf32> -> vector<32x128xf32>
    %147 = arith.truncf %12 : vector<32x16xf32> to vector<32x16xbf16>
    %148 = arith.truncf %143 : vector<16x128xf32> to vector<16x128xbf16>
    %cst_99 = arith.constant dense<0.000000e+00> : vector<32x128xf32>
    %149 = tpu.matmul %147, %148, %cst_99 {dimension_numbers = #tpu.dot_dimension_numbers<[1], [0], [0], [1], [0, 0, 1, 1], [], []>} : vector<32x16xbf16>, vector<16x128xbf16>, vector<32x128xf32> -> vector<32x128xf32>
    %c0_100 = arith.constant 0 : index
    %c0_101 = arith.constant 0 : index
    %150 = vector.load %arg5[%c0_100, %c0_101] : memref<128x128xbf16, #tpu.memory_space<vmem>>, vector<128x128xbf16>
    %151 = arith.truncf %146 : vector<32x128xf32> to vector<32x128xbf16>
    %cst_102 = arith.constant dense<0.000000e+00> : vector<32x128xf32>
    %152 = tpu.matmul %151, %150, %cst_102 {dimension_numbers = #tpu.dot_dimension_numbers<[1], [0], [0], [1], [0, 0, 1, 1], [], []>} : vector<32x128xbf16>, vector<128x128xbf16>, vector<32x128xf32> -> vector<32x128xf32>
    %c0_103 = arith.constant 0 : index
    %c0_104 = arith.constant 0 : index
    %153 = vector.load %arg6[%c0_103, %c0_104] : memref<128x128xbf16, #tpu.memory_space<vmem>>, vector<128x128xbf16>
    %154 = arith.truncf %149 : vector<32x128xf32> to vector<32x128xbf16>
    %cst_105 = arith.constant dense<0.000000e+00> : vector<32x128xf32>
    %155 = tpu.matmul %154, %153, %cst_105 {dimension_numbers = #tpu.dot_dimension_numbers<[1], [0], [0], [1], [0, 0, 1, 1], [], []>} : vector<32x128xbf16>, vector<128x128xbf16>, vector<32x128xf32> -> vector<32x128xf32>
    %156 = arith.addf %152, %155 : vector<32x128xf32>
    %c0_106 = arith.constant 0 : index
    %c0_107 = arith.constant 0 : index
    %157 = vector.load %arg7[%c0_106, %c0_107] : memref<128x128xbf16, #tpu.memory_space<vmem>>, vector<128x128xbf16>
    %158 = arith.truncf %21 : vector<32x128xf32> to vector<32x128xbf16>
    %cst_108 = arith.constant dense<0.000000e+00> : vector<32x128xf32>
    %159 = tpu.matmul %158, %157, %cst_108 {dimension_numbers = #tpu.dot_dimension_numbers<[1], [0], [0], [1], [0, 0, 1, 1], [], []>} : vector<32x128xbf16>, vector<128x128xbf16>, vector<32x128xf32> -> vector<32x128xf32>
    %160 = arith.addf %156, %159 : vector<32x128xf32>
    %c0_109 = arith.constant 0 : index
    %c0_110 = arith.constant 0 : index
    %161 = vector.load %arg8[%c0_109, %c0_110] : memref<1x128xf32, #tpu.memory_space<vmem>>, vector<1x128xf32>
    %162 = vector.broadcast %161 : vector<1x128xf32> to vector<32x128xf32>
    %163 = arith.addf %160, %162 : vector<32x128xf32>
    %cst_111 = arith.constant 0.000000e+00 : f32
    %164 = vector.broadcast %cst_111 : f32 to vector<32x128xf32>
    %165 = arith.maximumf %163, %164 : vector<32x128xf32>
    %c0_112 = arith.constant 0 : index
    %c0_113 = arith.constant 0 : index
    %166 = vector.load %arg9[%c0_112, %c0_113] : memref<128x128xbf16, #tpu.memory_space<vmem>>, vector<128x128xbf16>
    %167 = arith.truncf %165 : vector<32x128xf32> to vector<32x128xbf16>
    %cst_114 = arith.constant dense<0.000000e+00> : vector<32x128xf32>
    %168 = tpu.matmul %167, %166, %cst_114 {dimension_numbers = #tpu.dot_dimension_numbers<[1], [0], [0], [1], [0, 0, 1, 1], [], []>} : vector<32x128xbf16>, vector<128x128xbf16>, vector<32x128xf32> -> vector<32x128xf32>
    %c0_115 = arith.constant 0 : index
    %c0_116 = arith.constant 0 : index
    %169 = vector.load %arg10[%c0_115, %c0_116] : memref<1x128xf32, #tpu.memory_space<vmem>>, vector<1x128xf32>
    %170 = vector.broadcast %169 : vector<1x128xf32> to vector<32x128xf32>
    %171 = arith.addf %168, %170 : vector<32x128xf32>
    %cst_117 = arith.constant 0.000000e+00 : f32
    %172 = vector.broadcast %cst_117 : f32 to vector<32x128xf32>
    %173 = arith.maximumf %171, %172 : vector<32x128xf32>
    %c0_118 = arith.constant 0 : index
    %c0_119 = arith.constant 0 : index
    %174 = vector.load %arg21[%c0_118, %c0_119] : memref<16x128xf32, #tpu.memory_space<vmem>>, vector<16x128xf32>
    tpu.vector_store %arg21[%c0_118, %c0_119], %143 {strides = array<i32>} : memref<16x128xf32, #tpu.memory_space<vmem>>, vector<16x128xf32>,
    %c0_120 = arith.constant 0 : index
    %c0_121 = arith.constant 0 : index
    %175 = vector.load %arg22[%c0_120, %c0_121] : memref<32x128xf32, #tpu.memory_space<vmem>>, vector<32x128xf32>
    tpu.vector_store %arg22[%c0_120, %c0_121], %173 {strides = array<i32>} : memref<32x128xf32, #tpu.memory_space<vmem>>, vector<32x128xf32>,
    return
  }
}

</mosaic_0001>

<bundles_post_ra>
// kernel: mpn_recurrent_forward.1
= control target key start
LH: loop header
LB: loop body
LE: loop exit
PB: predicated region body
PF: predicated region fallthrough
CT: control target
= control target key end

     0   :  { %s4543_s0 = inlined_call_operand.vmem [shape: s32[32,1], index: 0, kind: input, shape index: {}]   ;;  %s4544_s1 = inlined_call_operand.vmem [shape: s32[32,1], index: 1, kind: input, shape index: {}]   ;;  %s4545_s2 = inlined_call_operand.vmem [shape: s32[1,32], index: 2, kind: input, shape index: {}]   ;;  %s4546_s3 = inlined_call_operand.vmem [shape: f32[16,128], index: 3, kind: input, shape index: {}]   ;;  %s4547_s4 = inlined_call_operand.vmem [shape: f32[32,128], index: 4, kind: input, shape index: {}]   ;;  %s4548_s5 = inlined_call_operand.hbm [shape: bf16[128,128], index: 5, kind: input, shape index: {}]   ;;  %s4549_s6 = inlined_call_operand.hbm [shape: bf16[128,128], index: 6, kind: input, shape index: {}]   ;;  %s4550_s7 = inlined_call_operand.hbm [shape: bf16[128,128], index: 7, kind: input, shape index: {}]   ;;  %s4551_s8 = inlined_call_operand.hbm [shape: f32[1,128], index: 8, kind: input, shape index: {}]   ;;  %s4552_s9 = inlined_call_operand.hbm [shape: bf16[128,128], index: 9, kind: input, shape index: {}]   ;;  %s4553_s10 = inlined_call_operand.hbm [shape: f32[1,128], index: 10, kind: input, shape index: {}]   ;;  %s4554_s11 = inlined_call_operand.hbm [shape: bf16[128,128], index: 11, kind: input, shape index: {}]   ;;  %s4555_s12 = inlined_call_operand.vmem [shape: bf16[128,128], index: 12, kind: input, shape index: {}]   ;;  %s4556_s13 = inlined_call_operand.hbm [shape: f32[1,128], index: 13, kind: input, shape index: {}]   ;;  %s4557_s14 = inlined_call_operand.vmem [shape: bf16[128,128], index: 14, kind: input, shape index: {}]   ;;  %s4558_s15 = inlined_call_operand.hbm [shape: f32[1,128], index: 15, kind: input, shape index: {}]   ;;  %s4559_s16 = inlined_call_operand.vmem [shape: bf16[128,128], index: 16, kind: input, shape index: {}]   ;;  %s4560_s17 = inlined_call_operand.vmem [shape: bf16[128,128], index: 17, kind: input, shape index: {}]   ;;  %s4561_s18 = inlined_call_operand.hbm [shape: f32[1,128], index: 18, kind: input, shape index: {}]   ;;  %s4562_s19 = inlined_call_operand.vmem [shape: bf16[128,128], index: 19, kind: input, shape index: {}]   ;;  %s4563_s20 = inlined_call_operand.hbm [shape: f32[1,128], index: 20, kind: input, shape index: {}]   ;;  %s4564_s21 = inlined_call_operand.hbm [shape: f32[16,128], index: 21, kind: output, shape index: {0}]   ;;  %s4565_s22 = inlined_call_operand.vmem [shape: f32[32,128], index: 22, kind: output, shape index: {1}]  }
   0x1   :  { %4634 = sst [smem:[#allocation61_spill]] %s4543_s0 }
   0x2   :  { %4635 = sst [smem:[#allocation62_spill]] %s4544_s1 }
   0x3   :  { %4636 = sst [smem:[#allocation63_spill]] %s4545_s2 }
   0x4   :  { %4637 = sst [smem:[#allocation64_spill]] %s4546_s3 }
   0x5   :  { %4638 = sst [smem:[#allocation65_spill]] %s4547_s4 }
   0x6   :  { %4639 = sst [smem:[#allocation66_spill]] %s4548_s5 }
   0x7   :  { %4640 = sst [smem:[#allocation67_spill]] %s4549_s6 }
   0x8   :  { %28 = vsyncpa [#allocation3], 0 }
   0x9   :  { %29 = vsyncpa [#allocation6], 0 }
   0xa   :  { %30 = vsyncpa [#allocation9], 0 }
   0xb   :  { %31 = vsyncpa [#allocation12], 0 }
   0xc   :  { %32 = vsyncpa [#allocation15], 0 }
   0xd   :  { %33 = vsyncpa [#allocation18], 0 }
   0xe   :  { %34 = vsyncpa [#allocation4], 0  ;;  %s3454_s3 = smov [#allocation5]   ;;  %s3455_s29 = smov [#allocation8]  }
   0xf   :  { %s62_s28 = sshll.u32 %s3454_s3, 4  ;;  %s87_s30 = sshll.u32 %s3455_s29, 4  ;;  %s63_s28 = int_to_ptr.vmem [resolvable:$true] %s62_s28  ;;  %s3588_s30 = int_to_ptr.vmem [resolvable:$true] %s87_s30 }
  0x10   :  { %s4641_s23 = sld [smem:[#allocation67_spill]] }
  0x16   :  { %s3176_s1 = scalar_lea.hbm %s4641_s23, 1024 }
  0x17   :  { %p3177_p0 = scmp.ne.s32.totalorder %s4641_s23, %s3176_s1  ;;  %p3180_p1 = scmp.lt.u32.totalorder %s3176_s1, %s4641_s23 }
  0x19   :  { %p3182_p2 = pnand %p3180_p1, %p3177_p0 }
  0x1b   :  { %3185 = shalt.err (!%p3182_p2)
}
  0x1c   :  { %s3186_s26 = scalar_lea.vmem %s63_s28, 1024  ;;  %p3191_p4 = scmp.lt.s32.totalorder %s63_s28, %s63_s28 }
  0x1d   :  { %p3187_p3 = scmp.ne.s32.totalorder %s63_s28, %s3186_s26  ;;  %p3192_p5 = scmp.lt.s32.totalorder %s3186_s26, %s3186_s26 }
  0x1f   :  { %p3193_p6 = por %p3192_p5, %p3191_p4 }
  0x21   :  { %p3194_p7 = pnand %p3193_p6, %p3187_p3 }
  0x23   :  { %3197 = shalt.err (!%p3194_p7)
}
  0x24   :  { %s4572_s2 = smov 64   ;;  %s3457_s27 = smov 4  }
  0x25   :  { %68 = dma.hbm_to_vmem [thread:$0]  %s4641_s23, 1024, %s63_s28, [#allocation6], %s4572_s2, %s4572_s2, %s3457_s27  }
  0x26   :  { %s3198_s1 = scalar_lea.hbm %s4551_s8, 16 }
  0x27   :  { %p3199_p8 = scmp.ne.s32.totalorder %s4551_s8, %s3198_s1  ;;  %p3202_p9 = scmp.lt.u32.totalorder %s3198_s1, %s4551_s8 }
  0x29   :  { %p3204_p10 = pnand %p3202_p9, %p3199_p8 }
  0x2b   :  { %3207 = shalt.err (!%p3204_p10)
}
  0x2c   :  { %s3208_s26 = scalar_lea.vmem %s3588_s30, 16  ;;  %s3212_s28 = scalar_lea.vmem %s3588_s30, 32 }
  0x2d   :  { %p3209_p11 = scmp.ne.s32.totalorder %s3588_s30, %s3208_s26  ;;  %p3213_p12 = scmp.lt.s32.totalorder %s3588_s30, %s3588_s30 }
  0x2e   :  { %p3214_p13 = scmp.lt.s32.totalorder %s3212_s28, %s3208_s26 }
  0x30   :  { %p3215_p0 = por %p3214_p13, %p3213_p12 }
  0x32   :  { %p3216_p1 = pnand %p3215_p0, %p3209_p11 }
  0x34   :  { %3219 = shalt.err (!%p3216_p1)
}
  0x35   :  { %90 = dma.hbm_to_vmem [thread:$0]  %s4551_s8, 16, %s3588_s30, [#allocation9]  }
  0x36   :  { %s3458_s29 = smov [#allocation11]   ;;  %s3459_s0 = smov [#allocation14]  }
  0x37   :  { %s109_s4 = sshll.u32 %s3458_s29, 4  ;;  %s133_s1 = sshll.u32 %s3459_s0, 4  ;;  %s110_s4 = int_to_ptr.vmem [resolvable:$true] %s109_s4  ;;  %s134_s1 = int_to_ptr.vmem [resolvable:$true] %s133_s1 }
  0x38   :  { %s3220_s6 = scalar_lea.hbm %s4553_s10, 16 }
  0x39   :  { %p3221_p2 = scmp.ne.s32.totalorder %s4553_s10, %s3220_s6  ;;  %p3224_p3 = scmp.lt.u32.totalorder %s3220_s6, %s4553_s10 }
  0x3b   :  { %p3226_p4 = pnand %p3224_p3, %p3221_p2 }
  0x3d   :  { %3229 = shalt.err (!%p3226_p4)
}
  0x3e   :  { %s3230_s8 = scalar_lea.vmem %s110_s4, 16  ;;  %s3234_s30 = scalar_lea.vmem %s110_s4, 32 }
  0x3f   :  { %p3231_p5 = scmp.ne.s32.totalorder %s110_s4, %s3230_s8  ;;  %p3235_p6 = scmp.lt.s32.totalorder %s110_s4, %s110_s4 }
  0x40   :  { %p3236_p7 = scmp.lt.s32.totalorder %s3234_s30, %s3230_s8 }
  0x42   :  { %p3237_p8 = por %p3236_p7, %p3235_p6 }
  0x44   :  { %p3238_p9 = pnand %p3237_p8, %p3231_p5 }
  0x46   :  { %3241 = shalt.err (!%p3238_p9)
}
  0x47   :  { %112 = dma.hbm_to_vmem [thread:$0]  %s4553_s10, 16, %s110_s4, [#allocation12]  }
  0x48   :  { %s3242_s5 = scalar_lea.hbm %s4556_s13, 16 }
  0x49   :  { %p3243_p10 = scmp.ne.s32.totalorder %s4556_s13, %s3242_s5  ;;  %p3246_p11 = scmp.lt.u32.totalorder %s3242_s5, %s4556_s13 }
  0x4b   :  { %p3248_p12 = pnand %p3246_p11, %p3243_p10 }
  0x4d   :  { %3251 = shalt.err (!%p3248_p12)
}
  0x4e   :  { %s3252_s26 = scalar_lea.vmem %s134_s1, 16  ;;  %s3256_s28 = scalar_lea.vmem %s134_s1, 32 }
  0x4f   :  { %p3253_p13 = scmp.ne.s32.totalorder %s134_s1, %s3252_s26  ;;  %p3257_p0 = scmp.lt.s32.totalorder %s134_s1, %s134_s1 }
  0x50   :  { %p3258_p1 = scmp.lt.s32.totalorder %s3256_s28, %s3252_s26 }
  0x52   :  { %p3259_p2 = por %p3258_p1, %p3257_p0 }
  0x54   :  { %p3260_p3 = pnand %p3259_p2, %p3253_p13 }
  0x56   :  { %3263 = shalt.err (!%p3260_p3)
}
  0x57   :  { %136 = dma.hbm_to_vmem [thread:$0]  %s4556_s13, 16, %s134_s1, [#allocation15]  }
  0x58   :  { %s3460_s8 = smov [#allocation17]   ;;  %s3461_s23 = smov [#allocation2]  }
  0x59   :  { %s159_s30 = sshll.u32 %s3460_s8, 4  ;;  %s50_s3 = sshll.u32 %s3461_s23, 4  ;;  %s160_s30 = int_to_ptr.vmem [resolvable:$true] %s159_s30  ;;  %s3647_s3 = int_to_ptr.vmem [resolvable:$true] %s50_s3 }
  0x5a   :  { %s3264_s5 = scalar_lea.hbm %s4561_s18, 16 }
  0x5b   :  { %p3265_p4 = scmp.ne.s32.totalorder %s4561_s18, %s3264_s5  ;;  %p3268_p5 = scmp.lt.u32.totalorder %s3264_s5, %s4561_s18 }
  0x5d   :  { %p3270_p6 = pnand %p3268_p5, %p3265_p4 }
  0x5f   :  { %3273 = shalt.err (!%p3270_p6)
}
  0x60   :  { %s3274_s13 = scalar_lea.vmem %s160_s30, 16  ;;  %s3278_s1 = scalar_lea.vmem %s160_s30, 32 }
  0x61   :  { %p3275_p7 = scmp.ne.s32.totalorder %s160_s30, %s3274_s13  ;;  %p3279_p8 = scmp.lt.s32.totalorder %s160_s30, %s160_s30 }
  0x62   :  { %p3280_p9 = scmp.lt.s32.totalorder %s3278_s1, %s3274_s13 }
  0x64   :  { %p3281_p10 = por %p3280_p9, %p3279_p8 }
  0x66   :  { %p3282_p11 = pnand %p3281_p10, %p3275_p7 }
  0x68   :  { %3285 = shalt.err (!%p3282_p11)
}
  0x69   :  { %162 = dma.hbm_to_vmem [thread:$0]  %s4561_s18, 16, %s160_s30, [#allocation18]  }
  0x6a   :  { %s4642_s8 = sld [smem:[#allocation66_spill]] }
  0x70   :  { %s3286_s23 = scalar_lea.hbm %s4642_s8, 1024 }
  0x71   :  { %p3287_p12 = scmp.ne.s32.totalorder %s4642_s8, %s3286_s23  ;;  %p3290_p13 = scmp.lt.u32.totalorder %s3286_s23, %s4642_s8 }
  0x73   :  { %p3292_p0 = pnand %p3290_p13, %p3287_p12 }
  0x75   :  { %3295 = shalt.err (!%p3292_p0)
}
  0x76   :  { %s3296_s24 = scalar_lea.vmem %s3647_s3, 1024  ;;  %p3301_p2 = scmp.lt.s32.totalorder %s3647_s3, %s3647_s3 }
  0x77   :  { %p3297_p1 = scmp.ne.s32.totalorder %s3647_s3, %s3296_s24  ;;  %p3302_p3 = scmp.lt.s32.totalorder %s3296_s24, %s3296_s24 }
  0x79   :  { %p3303_p4 = por %p3302_p3, %p3301_p2 }
  0x7b   :  { %p3304_p5 = pnand %p3303_p4, %p3297_p1 }
  0x7d   :  { %3307 = shalt.err (!%p3304_p5)
}
  0x7e   :  { %s4643_s18 = smov 64   ;;  %s3462_s25 = smov [#allocation7]  }
  0x7f   :  { %56 = dma.hbm_to_vmem [thread:$0]  %s4642_s8, 1024, %s3647_s3, [#allocation3], %s4643_s18, %s4643_s18, %s3457_s27  }
  0x80   :  { %s74_s13 = sshll.u32 %s3462_s25, 4  ;;  %s3463_s1 = smov [#allocation10]   ;;  %s75_s13 = int_to_ptr.vmem [resolvable:$true] %s74_s13 }
  0x81   :  { %s96_s26 = sshll.u32 %s3463_s1, 4  ;;  %s3308_s4 = scalar_lea.hbm %s4550_s7, 1024  ;;  %s3681_s26 = int_to_ptr.vmem [resolvable:$true] %s96_s26 }
  0x82   :  { %p3309_p6 = scmp.ne.s32.totalorder %s4550_s7, %s3308_s4  ;;  %p3312_p7 = scmp.lt.u32.totalorder %s3308_s4, %s4550_s7 }
  0x84   :  { %p3314_p8 = pnand %p3312_p7, %p3309_p6 }
  0x86   :  { %3317 = shalt.err (!%p3314_p8)
}
  0x87   :  { %s3318_s3 = scalar_lea.vmem %s75_s13, 1024  ;;  %p3323_p10 = scmp.lt.s32.totalorder %s75_s13, %s75_s13 }
  0x88   :  { %p3319_p9 = scmp.ne.s32.totalorder %s75_s13, %s3318_s3  ;;  %p3324_p11 = scmp.lt.s32.totalorder %s3318_s3, %s3318_s3 }
  0x8a   :  { %p3325_p12 = por %p3324_p11, %p3323_p10 }
  0x8c   :  { %p3326_p13 = pnand %p3325_p12, %p3319_p9 }
  0x8e   :  { %3329 = shalt.err (!%p3326_p13)
}
  0x8f   :  { %80 = dma.hbm_to_vmem [thread:$0]  %s4550_s7, 1024, %s75_s13, [#allocation6], %s4643_s18, %s4643_s18, %s3457_s27  }
  0x90   :  { %s3330_s6 = scalar_lea.hbm %s4552_s9, 1024 }
  0x91   :  { %p3331_p0 = scmp.ne.s32.totalorder %s4552_s9, %s3330_s6  ;;  %p3334_p1 = scmp.lt.u32.totalorder %s3330_s6, %s4552_s9 }
  0x93   :  { %p3336_p2 = pnand %p3334_p1, %p3331_p0 }
  0x95   :  { %3339 = shalt.err (!%p3336_p2)
}
  0x96   :  { %s3340_s4 = scalar_lea.vmem %s3681_s26, 1024  ;;  %p3345_p4 = scmp.lt.s32.totalorder %s3681_s26, %s3681_s26 }
  0x97   :  { %p3341_p3 = scmp.ne.s32.totalorder %s3681_s26, %s3340_s4  ;;  %p3346_p5 = scmp.lt.s32.totalorder %s3340_s4, %s3340_s4 }
  0x99   :  { %p3347_p6 = por %p3346_p5, %p3345_p4 }
  0x9b   :  { %p3348_p7 = pnand %p3347_p6, %p3341_p3 }
  0x9d   :  { %3351 = shalt.err (!%p3348_p7)
}
  0x9e   :  { %102 = dma.hbm_to_vmem [thread:$0]  %s4552_s9, 1024, %s3681_s26, [#allocation9], %s4643_s18, %s4643_s18, %s3457_s27  }
  0x9f   :  { %s3464_s23 = smov [#allocation13]   ;;  %s3465_s0 = smov [#allocation16]  }
  0xa0   :  { %s118_s29 = sshll.u32 %s3464_s23, 4  ;;  %s145_s5 = sshll.u32 %s3465_s0, 4  ;;  %s119_s29 = int_to_ptr.vmem [resolvable:$true] %s118_s29  ;;  %s146_s5 = int_to_ptr.vmem [resolvable:$true] %s145_s5 }
  0xa1   :  { %s3352_s2 = scalar_lea.hbm %s4554_s11, 1024 }
  0xa2   :  { %p3353_p8 = scmp.ne.s32.totalorder %s4554_s11, %s3352_s2  ;;  %p3356_p9 = scmp.lt.u32.totalorder %s3352_s2, %s4554_s11 }
  0xa4   :  { %p3358_p10 = pnand %p3356_p9, %p3353_p8 }
  0xa6   :  { %3361 = shalt.err (!%p3358_p10)
}
  0xa7   :  { %s3362_s9 = scalar_lea.vmem %s119_s29, 1024  ;;  %p3367_p12 = scmp.lt.s32.totalorder %s119_s29, %s119_s29 }
  0xa8   :  { %p3363_p11 = scmp.ne.s32.totalorder %s119_s29, %s3362_s9  ;;  %p3368_p13 = scmp.lt.s32.totalorder %s3362_s9, %s3362_s9 }
  0xaa   :  { %p3369_p0 = por %p3368_p13, %p3367_p12 }
  0xac   :  { %p3370_p1 = pnand %p3369_p0, %p3363_p11 }
  0xae   :  { %3373 = shalt.err (!%p3370_p1)
}
  0xaf   :  { %124 = dma.hbm_to_vmem [thread:$0]  %s4554_s11, 1024, %s119_s29, [#allocation12], %s4643_s18, %s4643_s18, %s3457_s27  }
  0xb0   :  { %s3374_s4 = scalar_lea.hbm %s4558_s15, 16 }
  0xb1   :  { %p3375_p2 = scmp.ne.s32.totalorder %s4558_s15, %s3374_s4  ;;  %p3378_p3 = scmp.lt.u32.totalorder %s3374_s4, %s4558_s15 }
  0xb3   :  { %p3380_p4 = pnand %p3378_p3, %p3375_p2 }
  0xb5   :  { %3383 = shalt.err (!%p3380_p4)
}
  0xb6   :  { %s3384_s3 = scalar_lea.vmem %s146_s5, 16  ;;  %s3388_s8 = scalar_lea.vmem %s146_s5, 32 }
  0xb7   :  { %p3385_p5 = scmp.ne.s32.totalorder %s146_s5, %s3384_s3  ;;  %p3389_p6 = scmp.lt.s32.totalorder %s146_s5, %s146_s5 }
  0xb8   :  { %p3390_p7 = scmp.lt.s32.totalorder %s3388_s8, %s3384_s3 }
  0xba   :  { %p3391_p8 = por %p3390_p7, %p3389_p6 }
  0xbc   :  { %p3392_p9 = pnand %p3391_p8, %p3385_p5 }
  0xbe   :  { %3395 = shalt.err (!%p3392_p9)
}
  0xbf   :  { %148 = dma.hbm_to_vmem [thread:$0]  %s4558_s15, 16, %s146_s5, [#allocation15]  }
  0xc0   :  { %s3466_s18 = smov [#allocation19]   ;;  %s3396_s30 = scalar_lea.hbm %s4563_s20, 16 }
  0xc1   :  { %s171_s29 = sshll.u32 %s3466_s18, 4  ;;  %p3397_p10 = scmp.ne.s32.totalorder %s4563_s20, %s3396_s30  ;;  %s172_s29 = int_to_ptr.vmem [resolvable:$true] %s171_s29 }
  0xc2   :  { %p3400_p11 = scmp.lt.u32.totalorder %s3396_s30, %s4563_s20 }
  0xc4   :  { %p3402_p12 = pnand %p3400_p11, %p3397_p10 }
  0xc6   :  { %3405 = shalt.err (!%p3402_p12)
}
  0xc7   :  { %s3406_s1 = scalar_lea.vmem %s172_s29, 16  ;;  %s3410_s15 = scalar_lea.vmem %s172_s29, 32 }
  0xc8   :  { %p3407_p13 = scmp.ne.s32.totalorder %s172_s29, %s3406_s1  ;;  %p3411_p0 = scmp.lt.s32.totalorder %s172_s29, %s172_s29 }
  0xc9   :  { %p3412_p1 = scmp.lt.s32.totalorder %s3410_s15, %s3406_s1 }
  0xcb   :  { %p3413_p2 = por %p3412_p1, %p3411_p0 }
  0xcd   :  { %p3414_p3 = pnand %p3413_p2, %p3407_p13 }
  0xcf   :  { %3417 = shalt.err (!%p3414_p3)
}
  0xd0   :  { %174 = dma.hbm_to_vmem [thread:$0]  %s4563_s20, 16, %s172_s29, [#allocation18]  }
  0xd1   :  { %3440 = dma.done.wait [#allocation3], 1024  }
  0xd2   :  { %3441 = vsyncadd [#allocation3], 4294966272 }
  0xd3   :  { %3442 = dma.done.wait [#allocation6], 2048  }
  0xd4   :  { %3443 = vsyncadd [#allocation6], 4294965248 }
  0xd5   :  { %3444 = dma.done.wait [#allocation9], 1040  }
  0xd6   :  { %3445 = vsyncadd [#allocation9], 4294966256 }
  0xd7   :  { %3446 = dma.done.wait [#allocation12], 1040  }
  0xd8   :  { %3447 = vsyncadd [#allocation12], 4294966256 }
  0xd9   :  { %3448 = dma.done.wait [#allocation15], 32  }
  0xda   :  { %3449 = vsyncadd [#allocation15], 4294967264 }
  0xdb   :  { %3450 = dma.done.wait [#allocation18], 32  }
  0xdc   :  { %3451 = vsyncadd [#allocation18], 4294967264  ;;  %v3467_v0 = vmov 0   ;;  %s4644_s7 = sld [smem:[#allocation61_spill]]  ;;  %s4645_s18 = sld [smem:[#allocation64_spill]]  ;;  %v3091_v12 = vld [vmem:[%s4555_s12] sm:$0xff]   ;;  %v209_v33 = vlaneseq }
  0xdd   :  { %3090 = vset.pattern.permute.xlu1 %v3467_v0  ;;  %3089 = vset.pattern.permute.xlu0 %v3467_v0  ;;  %s4646_s6 = sld [smem:[#allocation62_spill]]  ;;  %v3092_v13 = vld [vmem:[%s4555_s12 + $0x8] sm:$0xff]   ;;  %s4647_s23 = sld [smem:[#allocation65_spill]]  ;;  %v3093_v16 = vld [vmem:[%s4555_s12 + $0x10] sm:$0xff]   ;;  %v3094_v18 = vld [vmem:[%s4555_s12 + $0x18] sm:$0xff]   ;;  %vm280_vm4 = vcmask 130048  }
  0xde   :  { %2634 = vmatprep.subr.bf16.mxu1 %v3091_v12  ;;  %v3815_v19 = vld [vmem:[%s4555_s12 + $0x20] sm:$0xff]   ;;  %v3820_v20 = vld [vmem:[%s4555_s12 + $0x28] sm:$0xff]   ;;  %v3826_v21 = vld [vmem:[%s4555_s12 + $0x30] sm:$0xff]   ;;  %v3878_v34 = vand.u32 127, %v209_v33  ;;  %v4574_v39 = vmov 0.0   ;;  %vm3469_vm5 = vmmov 0  }
  0xdf   :  { %2635 = vmatpush3.bf16.msra.mxu1 %v3091_v12  ;;  %v3833_v22 = vld [vmem:[%s4555_s12 + $0x38] sm:$0xff]   ;;  %v3843_v25 = vld [vmem:[#allocation13] sm:$0xff]   ;;  %v3849_v27 = vld [vmem:[#allocation13 + $0x8] sm:$0xff]   ;;  %s4649_s8 = sld [smem:[#allocation63_spill]]  ;;  %vm710_vm8 = vcmask 261120  }
  0xe0   :  { %2636 = vmatprep.subr.bf16.mxu1 %v3092_v13  ;;  %v3854_v28 = vld [vmem:[#allocation13 + $0x10] sm:$0xff]   ;;  %v3858_v29 = vld [vmem:[#allocation13 + $0x18] sm:$0xff]   ;;  %v3862_v30 = vld [vmem:[#allocation13 + $0x20] sm:$0xff]  }
  0xe1   :  { %v3868_v31 = vld [vmem:[#allocation13 + $0x28] sm:$0xff]   ;;  %v3872_v32 = vld [vmem:[#allocation13 + $0x30] sm:$0xff]   ;;  %v3896_v46 = vld [vmem:[#allocation13 + $0x38] sm:$0xff]  }
  0xe2   :  { %v213_v1 = vld [vmem:[%s4644_s7 + $0x10] sm:$0xff]  ;;  %v211_v2 = vld [vmem:[%s4644_s7] sm:$0xff]  ;;  %v214_v3 = vld [vmem:[%s4644_s7 + $0x18] sm:$0xff] }
  0xe3   :  { %222 = vperm.xlu1 %3090, %v213_v1   ;;  %216 = vperm.xlu0 %3089, %v211_v2   ;;  %v212_v4 = vld [vmem:[%s4644_s7 + $0x8] sm:$0xff]  ;;  %v271_v5 = vld [vmem:[%s4645_s18] sm:$0xff]  ;;  %v238_v10 = vld [vmem:[%s4646_s6 + $0x18] sm:$0xff] }
  0xe4   :  { %v272_v6 = vld [vmem:[%s4645_s18 + $0x8] sm:$0xff]  ;;  %v235_v8 = vld [vmem:[%s4646_s6] sm:$0xff]  ;;  %v237_v11 = vld [vmem:[%s4646_s6 + $0x10] sm:$0xff]  ;;  %2637 = vmatpush3.bf16.msra.mxu1 %v3092_v13 }
  0xe5   :  { %v236_v7 = vld [vmem:[%s4646_s6 + $0x8] sm:$0xff]  ;;  %v3781_v9 = vpack.c.bf16 %v272_v6, %v271_v5  ;;  %v273_v14 = vld [vmem:[%s4647_s23] sm:$0xff]  ;;  %2638 = vmatprep.subr.bf16.mxu1 %v3093_v16  ;;  %v275_v23 = vld [vmem:[%s4647_s23 + $0x10] sm:$0xff] }
  0xe6   :  { %v274_v15 = vld [vmem:[%s4647_s23 + $0x8] sm:$0xff]  ;;  %v276_v24 = vld [vmem:[%s4647_s23 + $0x18] sm:$0xff]  ;;  %v3904_v47 = vld [vmem:[%s4557_s14] sm:$0xff]  }
  0xe7   :  { %225 = vperm.xlu1 %3090, %v214_v3   ;;  %219 = vperm.xlu0 %3089, %v212_v4   ;;  %v3806_v17 = vpack.c.bf16 %v274_v15, %v273_v14  ;;  %v3847_v26 = vpack.c.bf16 %v276_v24, %v275_v23  ;;  %v3909_v48 = vld [vmem:[%s4557_s14 + $0x8] sm:$0xff]   ;;  %v3917_v49 = vld [vmem:[%s4557_s14 + $0x10] sm:$0xff]   ;;  %v3924_v50 = vld [vmem:[%s4557_s14 + $0x18] sm:$0xff]  }
  0xe8   :  { %2628 = vmatprep.subr.bf16.mxu0 %v3781_v9  ;;  %2639 = vmatpush3.bf16.msra.mxu1 %v3093_v16  ;;  %v3931_v51 = vld [vmem:[%s4557_s14 + $0x20] sm:$0xff]   ;;  %v3938_v52 = vld [vmem:[%s4557_s14 + $0x28] sm:$0xff]   ;;  %v3946_v59 = vld [vmem:[%s4557_s14 + $0x30] sm:$0xff]  }
  0xe9   :  { %2629 = vmatpush3.bf16.msra.mxu0 %v3781_v9  ;;  %2650 = vmatprep.mubr.bf16.mxu1 %v3806_v17  ;;  %v3953_v60 = vld [vmem:[%s4557_s14 + $0x38] sm:$0xff]   ;;  %v3958_v61 = vld [vmem:[#allocation14] ss:$0 sm:$0xff]  ;;  %v3977_v14 = vld [vmem:[%s4559_s16 + $0x8] sm:$0xff]  }
  0xea   :  { %2640 = vmatprep.subr.bf16.mxu1 %v3094_v18  ;;  %2674 = vmatprep.subr.bf16.mxu0 %v3904_v47  ;;  %v3971_v13 = vld [vmem:[%s4559_s16] sm:$0xff]   ;;  %v3984_v15 = vld [vmem:[%s4559_s16 + $0x10] sm:$0xff]   ;;  %v3991_v16 = vld [vmem:[%s4559_s16 + $0x18] sm:$0xff]  }
  0xeb   :  { %243 = vperm.xlu1 %3090, %v236_v7   ;;  %240 = vperm.xlu0 %3089, %v235_v8   ;;  %v4005_v23 = vld [vmem:[%s4559_s16 + $0x28] sm:$0xff]   ;;  %v4012_v24 = vld [vmem:[%s4559_s16 + $0x30] sm:$0xff]  }
  0xec   :  { %2641 = vmatpush3.bf16.msra.mxu1 %v3094_v18  ;;  %v3998_v18 = vld [vmem:[%s4559_s16 + $0x20] sm:$0xff]  }
  0xed   :  { %2642 = vmatprep.subr.bf16.mxu1 %v3815_v19 }
  0xef   :  { %249 = vperm.xlu1 %3090, %v238_v10   ;;  %246 = vperm.xlu0 %3089, %v237_v11  }
  0xf0   :  { %2643 = vmatpush3.bf16.msra.mxu1 %v3815_v19 }
  0xf1   :  { %2644 = vmatprep.subr.bf16.mxu1 %v3820_v20 }
  0xf4   :  { %2645 = vmatpush3.bf16.msra.mxu1 %v3820_v20 }
  0xf5   :  { %2646 = vmatprep.subr.bf16.mxu1 %v3826_v21 }
  0xf8   :  { %2647 = vmatpush3.bf16.msra.mxu1 %v3826_v21 }
  0xf9   :  { %2648 = vmatprep.subr.bf16.mxu1 %v3833_v22 }
  0xfc   :  { %2649 = vmatpush3.bf16.msra.mxu1 %v3833_v22 }
  0xfd   :  { %2654 = vmatprep.subr.bf16.mxu1 %v3843_v25 }
  0xff   :  { %2651 = vmatmul.mubr.bf16.vlgmr.msra.gmra.mrb[0].mxu1 %v3847_v26 }
 0x100   :  { %2655 = vmatpush3.bf16.msra.mxu1 %v3843_v25 }
 0x101   :  { %2656 = vmatprep.subr.bf16.mxu1 %v3849_v27 }
 0x104   :  { %2657 = vmatpush3.bf16.msra.mxu1 %v3849_v27 }
 0x105   :  { %2658 = vmatprep.subr.bf16.mxu1 %v3854_v28 }
 0x108   :  { %2659 = vmatpush3.bf16.msra.mxu1 %v3854_v28 }
 0x109   :  { %2660 = vmatprep.subr.bf16.mxu1 %v3858_v29 }
 0x10c   :  { %2661 = vmatpush3.bf16.msra.mxu1 %v3858_v29 }
 0x10d   :  { %2662 = vmatprep.subr.bf16.mxu1 %v3862_v30 }
 0x110   :  { %2663 = vmatpush3.bf16.msra.mxu1 %v3862_v30 }
 0x111   :  { %2664 = vmatprep.subr.bf16.mxu1 %v3868_v31 }
 0x114   :  { %2665 = vmatpush3.bf16.msra.mxu1 %v3868_v31 }
 0x115   :  { %2666 = vmatprep.subr.bf16.mxu1 %v3872_v32 }
 0x118   :  { %2667 = vmatpush3.bf16.msra.mxu1 %v3872_v32 }
 0x119   :  { %2668 = vmatprep.subr.bf16.mxu1 %v3896_v46 }
 0x11c   :  { %2669 = vmatpush3.bf16.msra.mxu1 %v3896_v46 }
 0x11d   :  { %2722 = vmatprep.subr.bf16.mxu1 %v4574_v39 }
 0x162   :  { %v223_v35 = vpop.permute.xlu1 %222  ;;  %v217_v36 = vpop.permute.xlu0 %216 }
 0x163   :  { %vm229_vm0 = vcmp.eq.s32.totalorder %v223_v35, %v3878_v34  ;;  %vm227_vm1 = vcmp.eq.s32.totalorder %v217_v36, %v3878_v34  ;;  %v4019_v35 = vld [vmem:[%s4559_s16 + $0x38] sm:$0xff]   ;;  %v4025_v36 = vld [vmem:[#allocation16] ss:$0 sm:$0xff] }
 0x164   :  { %v233_v40 = vsel %vm229_vm0, 1.0, %v4574_v39  ;;  %v231_v41 = vsel %vm227_vm1, 1.0, %v4574_v39 }
 0x166   :  { %v226_v37 = vpop.permute.xlu1 %225  ;;  %v220_v38 = vpop.permute.xlu0 %219 }
 0x167   :  { %vm230_vm2 = vcmp.eq.s32.totalorder %v226_v37, %v3878_v34  ;;  %vm228_vm3 = vcmp.eq.s32.totalorder %v220_v38, %v3878_v34  ;;  %v260_v37 = vshrl.u32 %v209_v33, 7 }
 0x168   :  { %v234_v42 = vsel %vm230_vm2, 1.0, %v4574_v39  ;;  %v232_v43 = vsel %vm228_vm3, 1.0, %v4574_v39 }
 0x169   :  { %v3888_v44 = vpack.c.bf16 %v234_v42, %v233_v40  ;;  %v3890_v45 = vpack.c.bf16 %v232_v43, %v231_v41 }
 0x16b   :  { %4648 = vst [vmem:[#allocation28_spill] sm:$0xff] %v3888_v44  ;;  %2630 = vmatprep.mubr.msk.bf16.mxu0 %vm280_vm4, %v3890_v45 }
 0x16c   :  { %2631 = vmatmul.mubr.msk.bf16.vlgmr.msra.gmra.mrb[0].mxu0 %vm280_vm4, %v3888_v44 }
 0x16d   :  { %2675 = vmatpush3.bf16.msra.mxu0 %v3904_v47 }
 0x16e   :  { %2676 = vmatprep.subr.bf16.mxu0 %v3909_v48 }
 0x171   :  { %2677 = vmatpush3.bf16.msra.mxu0 %v3909_v48 }
 0x172   :  { %2678 = vmatprep.subr.bf16.mxu0 %v3917_v49 }
 0x175   :  { %2679 = vmatpush3.bf16.msra.mxu0 %v3917_v49 }
 0x176   :  { %2680 = vmatprep.subr.bf16.mxu0 %v3924_v50 }
 0x179   :  { %2681 = vmatpush3.bf16.msra.mxu0 %v3924_v50 }
 0x17a   :  { %2682 = vmatprep.subr.bf16.mxu0 %v3931_v51 }
 0x17d   :  { %2683 = vmatpush3.bf16.msra.mxu0 %v3931_v51 }
 0x17e   :  { %2684 = vmatprep.subr.bf16.mxu0 %v3938_v52 }
 0x181   :  { %2685 = vmatpush3.bf16.msra.mxu0 %v3938_v52 }
 0x182   :  { %2686 = vmatprep.subr.bf16.mxu0 %v3946_v59 }
 0x185   :  { %2687 = vmatpush3.bf16.msra.mxu0 %v3946_v59 }
 0x186   :  { %2688 = vmatprep.subr.bf16.mxu0 %v3953_v60 }
 0x189   :  { %2689 = vmatpush3.bf16.msra.mxu0 %v3953_v60 }
 0x18a   :  { %2694 = vmatprep.subr.bf16.mxu0 %v4574_v39 }
 0x23f   :  { %v2632_v53 = vpop.f32.mrb[0].mxu0 }
 0x240   :  { %v321_v54 = vpop.f32.mrb[1].mxu0 }
 0x241   :  { %v2633_v55 = vpop.f32.mrb[2].mxu0 }
 0x242   :  { %v353_v56 = vpack.c.bf16 %v2633_v55, %v2632_v53  ;;  %v324_v57 = vpop.f32.mrb[3].mxu0  ;;  %v261_v55 = vadd.s32 8, %v260_v37 }
 0x243   :  { %v352_v58 = vpack.c.bf16 %v324_v57, %v321_v54 }
 0x245   :  { %2670 = vmatprep.mubr.bf16.mxu1 %v352_v58 }
 0x246   :  { %2671 = vmatmul.mubr.bf16.vlgmr.msra.gmra.mrb[0].mxu1 %v353_v56 }
 0x247   :  { %2738 = vmatprep.mubr.msk.bf16.mxu1 %vm3469_vm5, %v4574_v39  ;;  %2723 = vmatpush3.bf16.msra.mxu1 %v3971_v13 }
 0x248   :  { %2724 = vmatprep.subr.bf16.mxu1 %v4574_v39 }
 0x24b   :  { %2725 = vmatpush3.bf16.msra.mxu1 %v3977_v14 }
 0x24c   :  { %2726 = vmatprep.subr.bf16.mxu1 %v4574_v39 }
 0x24f   :  { %2727 = vmatpush3.bf16.msra.mxu1 %v3984_v15 }
 0x250   :  { %2728 = vmatprep.subr.bf16.mxu1 %v4574_v39 }
 0x253   :  { %2729 = vmatpush3.bf16.msra.mxu1 %v3991_v16 }
 0x254   :  { %2730 = vmatprep.subr.bf16.mxu1 %v4574_v39 }
 0x257   :  { %2731 = vmatpush3.bf16.msra.mxu1 %v3998_v18 }
 0x258   :  { %2732 = vmatprep.subr.bf16.mxu1 %v4574_v39 }
 0x25b   :  { %2733 = vmatpush3.bf16.msra.mxu1 %v4005_v23 }
 0x25c   :  { %2734 = vmatprep.subr.bf16.mxu1 %v4574_v39 }
 0x25f   :  { %2735 = vmatpush3.bf16.msra.mxu1 %v4012_v24 }
 0x260   :  { %2736 = vmatprep.subr.bf16.mxu1 %v4574_v39 }
 0x263   :  { %2737 = vmatpush3.bf16.msra.mxu1 %v4019_v35 }
 0x266   :  { %2739 = vmatmul.mubr.bf16.vlgmr.msra.gmra.mrb[4].mxu1 %v3781_v9  ;;  %v2324_v9 = vld [vmem:[%s4649_s8] ss:$0 sm:$0xff] }
 0x267   :  { %2830 = vmatprep.mubr.bf16.mxu1 %v3806_v17  ;;  %vm267_vm6 = vcmp.eq.s32.totalorder %v2324_v9, %v260_v37  ;;  %vm268_vm7 = vcmp.eq.s32.totalorder %v2324_v9, %v261_v55  ;;  %v4119_v9 = vld [vmem:[%s4562_s19 + $0x10] sm:$0xff]  }
 0x319   :  { %v2672_v62 = vpop.f32.mrb[0].mxu1 }
 0x31a   :  { %v575_v63 = vadd.f32 %v2672_v62, %v3958_v61  ;;  %v551_v0 = vpop.f32.mrb[1].mxu1 }
 0x31b   :  { %v573_v1 = vadd.f32 %v3958_v61, %v551_v0  ;;  %v2673_v2 = vpop.f32.mrb[2].mxu1  ;;  %v269_v0 = vsel %vm267_vm6, 1.0, %v4574_v39 }
 0x31c   :  { %v576_v3 = vadd.f32 %v2673_v2, %v3958_v61  ;;  %v554_v4 = vpop.f32.mrb[3].mxu1  ;;  %v579_v6 = vmax.f32 %v575_v63, 0.0 }
 0x31d   :  { %v574_v5 = vadd.f32 %v3958_v61, %v554_v4  ;;  %v577_v8 = vmax.f32 %v573_v1, 0.0  ;;  %v270_v1 = vsel %vm268_vm7, 1.0, %v4574_v39  ;;  %v4052_v4 = vld [vmem:[%s4560_s17 + $0x8] sm:$0xff]  }
 0x31e   :  { %v580_v7 = vmax.f32 %v576_v3, 0.0  ;;  %v4038_v2 = vpack.c.bf16 %v270_v1, %v269_v0  ;;  %v4043_v3 = vld [vmem:[%s4560_s17] sm:$0xff]   ;;  %v4158_v0 = vld [vmem:[#allocation17] ss:$0 sm:$0xff] }
 0x31f   :  { %v578_v10 = vmax.f32 %v574_v5, 0.0  ;;  %v4061_v5 = vld [vmem:[%s4560_s17 + $0x10] sm:$0xff]   ;;  %4654 = vst [vmem:[#allocation33_spill] sm:$0xff] %v4158_v0 }
 0x320   :  { %v598_v11 = vpack.c.bf16 %v580_v7, %v579_v6  ;;  %v4068_v6 = vld [vmem:[%s4560_s17 + $0x18] sm:$0xff]   ;;  %v4075_v7 = vld [vmem:[%s4560_s17 + $0x20] sm:$0xff]  }
 0x321   :  { %v597_v12 = vpack.c.bf16 %v578_v10, %v577_v8  ;;  %v4082_v8 = vld [vmem:[%s4560_s17 + $0x28] sm:$0xff]   ;;  %v4089_v10 = vld [vmem:[%s4560_s17 + $0x30] sm:$0xff]  }
 0x323   :  { %2690 = vmatprep.mubr.bf16.mxu0 %v597_v12 }
 0x324   :  { %2691 = vmatmul.mubr.bf16.vlgmr.msra.gmra.mrb[4].mxu0 %v598_v11  ;;  %v4097_v11 = vld [vmem:[%s4560_s17 + $0x38] sm:$0xff]  }
 0x325   :  { %2698 = vmatprep.mubr.msk.bf16.mxu0 %vm3469_vm5, %v4574_v39 }
 0x339   :  { %v959_v12 = vpop.f32.mrb[4].mxu1 }
 0x33a   :  { %v2740_v37 = vpop.f32.mrb[5].mxu1 }
 0x3f7   :  { %v2692_v38 = vpop.f32.mrb[4].mxu0 }
 0x3f8   :  { %v697_v40 = vadd.f32 %v2692_v38, %v4025_v36  ;;  %v688_v41 = vpop.f32.mrb[5].mxu0  ;;  %v962_v38 = vpop.f32.mrb[6].mxu1 }
 0x3f9   :  { %v689_v42 = vadd.f32 %v4025_v36, %v688_v41  ;;  %v2693_v43 = vpop.f32.mrb[6].mxu0 }
 0x3fa   :  { %v700_v53 = vadd.f32 %v2693_v43, %v4025_v36  ;;  %v691_v54 = vpop.f32.mrb[7].mxu0  ;;  %v705_v17 = vmax.f32 %v697_v40, 0.0  ;;  %v2741_v40 = vpop.f32.mrb[7].mxu1 }
 0x3fb   :  { %v692_v56 = vadd.f32 %v4025_v36, %v691_v54  ;;  %v703_v33 = vmax.f32 %v689_v42, 0.0 }
 0x3fc   :  { %v706_v57 = vmax.f32 %v700_v53, 0.0  ;;  %v4104_v53 = vld [vmem:[%s4562_s19] sm:$0xff]  }
 0x3fd   :  { %v704_v58 = vmax.f32 %v692_v56, 0.0  ;;  %v4110_v56 = vld [vmem:[%s4562_s19 + $0x8] sm:$0xff]  }
 0x3fe   :  { %v709_v62 = vpack.c.bf16 %v706_v57, %v705_v17  ;;  %v4126_v17 = vld [vmem:[%s4562_s19 + $0x18] sm:$0xff]   ;;  %v4133_v57 = vld [vmem:[%s4562_s19 + $0x20] sm:$0xff]  }
 0x3ff   :  { %v708_v63 = vpack.c.bf16 %v704_v58, %v703_v33  ;;  %4650 = vst [vmem:[#allocation29_spill] sm:$0xff] %v4133_v57  ;;  %v4141_v33 = vld [vmem:[%s4562_s19 + $0x28] sm:$0xff]   ;;  %v4148_v58 = vld [vmem:[%s4562_s19 + $0x30] sm:$0xff]  }
 0x400   :  { %4651 = vst [vmem:[#allocation30_spill] sm:$0xff] %v4141_v33  ;;  %4652 = vst [vmem:[#allocation31_spill] sm:$0xff] %v4148_v58 }
 0x401   :  { %2695 = vmatpush3.bf16.msra.mxu0 %v708_v63 }
 0x402   :  { %2696 = vmatprep.subr.bf16.mxu0 %v4574_v39 }
 0x405   :  { %2697 = vmatpush3.bf16.msra.mxu0 %v709_v62  ;;  %v4155_v62 = vld [vmem:[%s4562_s19 + $0x38] sm:$0xff]  }
 0x406   :  { %2702 = vmatprep.subr.bf16.mxu0 %v4574_v39  ;;  %4653 = vst [vmem:[#allocation32_spill] sm:$0xff] %v4155_v62 }
 0x408   :  { %2699 = vmatmul.mubr.msk.bf16.vlgmr.msra.gmra.mrb[8].mxu0 %vm710_vm8, %v4038_v2 }
 0x409   :  { %2703 = vmatpush3.bf16.msra.mxu0 %v4043_v3  ;;  %2718 = vmatprep.mubr.msk.bf16.mxu0 %vm3469_vm5, %v4574_v39 }
 0x40a   :  { %2704 = vmatprep.subr.bf16.mxu0 %v4574_v39 }
 0x40d   :  { %2705 = vmatpush3.bf16.msra.mxu0 %v4052_v4 }
 0x40e   :  { %2706 = vmatprep.subr.bf16.mxu0 %v4574_v39 }
 0x411   :  { %2707 = vmatpush3.bf16.msra.mxu0 %v4061_v5 }
 0x412   :  { %2708 = vmatprep.subr.bf16.mxu0 %v4574_v39 }
 0x415   :  { %2709 = vmatpush3.bf16.msra.mxu0 %v4068_v6 }
 0x416   :  { %2710 = vmatprep.subr.bf16.mxu0 %v4574_v39 }
 0x419   :  { %2711 = vmatpush3.bf16.msra.mxu0 %v4075_v7 }
 0x41a   :  { %2712 = vmatprep.subr.bf16.mxu0 %v4574_v39 }
 0x41d   :  { %2713 = vmatpush3.bf16.msra.mxu0 %v4082_v8 }
 0x41e   :  { %2714 = vmatprep.subr.bf16.mxu0 %v4574_v39 }
 0x421   :  { %2715 = vmatpush3.bf16.msra.mxu0 %v4089_v10 }
 0x422   :  { %2716 = vmatprep.subr.bf16.mxu0 %v4574_v39 }
 0x425   :  { %2717 = vmatpush3.bf16.msra.mxu0 %v4097_v11 }
 0x426   :  { %2742 = vmatprep.subr.bf16.mxu0 %v4574_v39 }
 0x4db   :  { %v748_v41 = vpop.f32.mrb[8].mxu0 }
 0x4dc   :  { %v2700_v42 = vpop.f32.mrb[9].mxu0 }
 0x4dd   :  { %v751_v43 = vpop.f32.mrb[10].mxu0 }
 0x4de   :  { %v787_v54 = vpack.c.bf16 %v751_v43, %v748_v41  ;;  %v2701_v55 = vpop.f32.mrb[11].mxu0 }
 0x4e0   :  { %2719 = vmatmul.mubr.bf16.vlgmr.msra.gmra.mrb[12].mxu0 %v787_v54 }
 0x4e1   :  { %2743 = vmatpush3.bf16.msra.mxu0 %v4104_v53  ;;  %2758 = vmatprep.mubr.msk.bf16.mxu0 %vm3469_vm5, %v4574_v39 }
 0x4e2   :  { %2744 = vmatprep.subr.bf16.mxu0 %v4574_v39 }
 0x4e5   :  { %2745 = vmatpush3.bf16.msra.mxu0 %v4110_v56 }
 0x4e6   :  { %2746 = vmatprep.subr.bf16.mxu0 %v4574_v39 }
 0x4e9   :  { %2747 = vmatpush3.bf16.msra.mxu0 %v4119_v9 }
 0x4ea   :  { %2748 = vmatprep.subr.bf16.mxu0 %v4574_v39 }
 0x4ed   :  { %2749 = vmatpush3.bf16.msra.mxu0 %v4126_v17 }
 0x4ee   :  { %2750 = vmatprep.subr.bf16.mxu0 %v4574_v39 }
 0x4f1   :  { %2751 = vmatpush3.bf16.msra.mxu0 %v4133_v57 }
 0x4f2   :  { %2752 = vmatprep.subr.bf16.mxu0 %v4574_v39 }
 0x4f5   :  { %2753 = vmatpush3.bf16.msra.mxu0 %v4141_v33 }
 0x4f6   :  { %2754 = vmatprep.subr.bf16.mxu0 %v4574_v39 }
 0x4f9   :  { %2755 = vmatpush3.bf16.msra.mxu0 %v4148_v58 }
 0x4fa   :  { %2756 = vmatprep.subr.bf16.mxu0 %v4574_v39 }
 0x4fd   :  { %2757 = vmatpush3.bf16.msra.mxu0 %v4155_v62  ;;  %v4164_v62 = vld [vmem:[#allocation19] ss:$0 sm:$0xff] }
 0x4fe   :  { %4655 = vst [vmem:[#allocation34_spill] sm:$0xff] %v4164_v62 }
 0x5b3   :  { %v870_v63 = vpop.f32.mrb[12].mxu0 }
 0x5b4   :  { %v960_v1 = vadd.f32 %v959_v12, %v870_v63  ;;  %v2720_v37 = vpop.f32.mrb[13].mxu0 }
 0x5b5   :  { %v873_v40 = vpop.f32.mrb[14].mxu0  ;;  %v244_v37 = vpop.permute.xlu1 %243 }
 0x5b6   :  { %v973_v41 = vadd.f32 %v4158_v0, %v960_v1  ;;  %v963_v42 = vadd.f32 %v962_v38, %v873_v40  ;;  %v2721_v43 = vpop.f32.mrb[15].mxu0  ;;  %v241_v1 = vpop.permute.xlu0 %240  ;;  %vm252_vm9 = vcmp.eq.s32.totalorder %v244_v37, %v3878_v34 }
 0x5b7   :  { %vm251_vm10 = vcmp.eq.s32.totalorder %v241_v1, %v3878_v34 }
 0x5b8   :  { %v974_v54 = vadd.f32 %v4158_v0, %v963_v42  ;;  %v975_v55 = vmax.f32 %v973_v41, 0.0 }
 0x5ba   :  { %v976_v39 = vmax.f32 %v974_v54, 0.0 }
 0x5bc   :  { %v993_v58 = vpack.c.bf16 %v976_v39, %v975_v55  ;;  %v247_v55 = vpop.permute.xlu0 %246 }
 0x5bd   :  { %vm253_vm12 = vcmp.eq.s32.totalorder %v247_v55, %v3878_v34  ;;  %v4224_v55 = vld [vmem:[#allocation2] sm:$0xff]  }
 0x5be   :  { %2759 = vmatmul.mubr.bf16.vlgmr.msra.gmra.mrb[16].mxu0 %v993_v58  ;;  %v4656_v58 = vmov 0.0   ;;  %4666 = vst [vmem:[#allocation44_spill] sm:$0xff] %v4224_v55 }
 0x5bf   :  { %2764 = vmatprep.mubr.msk.bf16.mxu0 %vm280_vm4, %v3890_v45  ;;  %v256_v43 = vsel %vm252_vm9, 1.0, %v4656_v58  ;;  %v255_v54 = vsel %vm251_vm10, 1.0, %v4656_v58  ;;  %v257_v37 = vsel %vm253_vm12, 1.0, %v4656_v58 }
 0x691   :  { %v1083_v33 = vpop.f32.mrb[16].mxu0 }
 0x692   :  { %v1084_v12 = vadd.f32 %v4164_v62, %v1083_v33  ;;  %v2760_v63 = vpop.f32.mrb[17].mxu0  ;;  %v250_v33 = vpop.permute.xlu1 %249 }
 0x693   :  { %v1086_v57 = vpop.f32.mrb[18].mxu0  ;;  %vm254_vm11 = vcmp.eq.s32.totalorder %v250_v33, %v3878_v34  ;;  %v4199_v34 = vld [vmem:[#allocation5 + $0x10] sm:$0xff]   ;;  %v3147_v33 = vld [vmem:[#allocation7] sm:$0xff]  }
 0x694   :  { %v1087_v38 = vadd.f32 %v4164_v62, %v1086_v57  ;;  %v2761_v40 = vpop.f32.mrb[19].mxu0  ;;  %v1090_v42 = vmax.f32 %v1084_v12, 0.0  ;;  %v4177_v57 = vld [vmem:[#allocation5] sm:$0xff]   ;;  %v4179_v12 = vpack.c.bf16 %v256_v43, %v255_v54  ;;  %v258_v63 = vsel %vm254_vm11, 1.0, %v4656_v58  ;;  %4660 = vst [vmem:[#allocation38_spill] sm:$0xff] %v4199_v34  ;;  %v4216_v43 = vld [vmem:[#allocation5 + $0x30] sm:$0xff]   ;;  %2814 = vmatprep.subr.bf16.mxu1 %v3147_v33 }
 0x695   :  { %v4191_v1 = vpack.c.bf16 %v258_v63, %v257_v37  ;;  %v4203_v40 = vld [vmem:[#allocation5 + $0x18] sm:$0xff]   ;;  %4664 = vst [vmem:[#allocation42_spill] sm:$0xff] %v4216_v43  ;;  %2815 = vmatpush3.bf16.msra.mxu1 %v3147_v33  ;;  %v3149_v63 = vld [vmem:[#allocation7 + $0x8] sm:$0xff]   ;;  %v3151_v37 = vld [vmem:[#allocation7 + $0x10] sm:$0xff]  }
 0x696   :  { %v1091_v41 = vmax.f32 %v1087_v38, 0.0  ;;  %4657 = vst [vmem:[#allocation35_spill] sm:$0xff] %v4179_v12  ;;  %v4193_v38 = vld [vmem:[#allocation5 + $0x8] sm:$0xff]   ;;  %4661 = vst [vmem:[#allocation39_spill] sm:$0xff] %v4203_v40  ;;  %v4220_v54 = vld [vmem:[#allocation5 + $0x38] sm:$0xff]   ;;  %2816 = vmatprep.subr.bf16.mxu1 %v3149_v63 }
 0x697   :  { %4658 = vst [vmem:[#allocation36_spill] sm:$0xff] %v4191_v1  ;;  %4659 = vst [vmem:[#allocation37_spill] sm:$0xff] %v4193_v38  ;;  %v3159_v33 = vld [vmem:[#allocation7 + $0x30] sm:$0xff]   ;;  %v3161_v62 = vld [vmem:[#allocation7 + $0x38] sm:$0xff]  }
 0x698   :  { %v4170_v39 = vpack.c.bf16 %v1091_v41, %v1090_v42  ;;  %v4207_v42 = vld [vmem:[#allocation5 + $0x20] sm:$0xff]   ;;  %v4212_v41 = vld [vmem:[#allocation5 + $0x28] sm:$0xff]   ;;  %4665 = vst [vmem:[#allocation43_spill] sm:$0xff] %v4220_v54 }
 0x699   :  { %4662 = vst [vmem:[#allocation40_spill] sm:$0xff] %v4207_v42  ;;  %4663 = vst [vmem:[#allocation41_spill] sm:$0xff] %v4212_v41  ;;  %2817 = vmatpush3.bf16.msra.mxu1 %v3149_v63  ;;  %v4228_v63 = vld [vmem:[#allocation10] sm:$0xff]  }
 0x69a   :  { %2762 = vmatprep.subr.bf16.mxu0 %v4170_v39  ;;  %2818 = vmatprep.subr.bf16.mxu1 %v3151_v37  ;;  %4667 = vst [vmem:[#allocation45_spill] sm:$0xff] %v4228_v63 }
 0x69b   :  { %2763 = vmatpush3.bf16.msra.mxu0 %v4170_v39 }
 0x69c   :  { %2768 = vmatprep.subr.bf16.mxu0 %v4170_v39 }
 0x69d   :  { %2819 = vmatpush3.bf16.msra.mxu1 %v3151_v37  ;;  %v4230_v37 = vld [vmem:[#allocation10 + $0x8] sm:$0xff]  }
 0x69e   :  { %2765 = vmatmul.mubr.msk.bf16.vlgmr.msra.gmra.mrb[20].mxu0 %vm280_vm4, %v3888_v44  ;;  %v3157_v44 = vld [vmem:[#allocation7 + $0x28] sm:$0xff]   ;;  %4668 = vst [vmem:[#allocation46_spill] sm:$0xff] %v4230_v37 }
 0x69f   :  { %2769 = vmatpush3.bf16.msra.mxu0 %v4170_v39  ;;  %2770 = vmatprep.mubr.msk.bf16.mxu0 %vm280_vm4, %v4179_v12  ;;  %v3155_v12 = vld [vmem:[#allocation7 + $0x20] sm:$0xff]  }
 0x6a0   :  { %2774 = vmatprep.subr.bf16.mxu0 %v4177_v57 }
 0x6a6   :  { %2771 = vmatmul.mubr.msk.bf16.vlgmr.msra.gmra.mrb[24].mxu0 %vm280_vm4, %v4191_v1  ;;  %v3153_v1 = vld [vmem:[#allocation7 + $0x18] sm:$0xff]  }
 0x6a7   :  { %2775 = vmatpush3.bf16.msra.mxu0 %v4177_v57  ;;  %2820 = vmatprep.subr.bf16.mxu1 %v3153_v1 }
 0x6a8   :  { %2776 = vmatprep.subr.bf16.mxu0 %v4193_v38  ;;  %2821 = vmatpush3.bf16.msra.mxu1 %v3153_v1 }
 0x6a9   :  { %2822 = vmatprep.subr.bf16.mxu1 %v3155_v12 }
 0x6ab   :  { %2777 = vmatpush3.bf16.msra.mxu0 %v4193_v38 }
 0x6ac   :  { %2778 = vmatprep.subr.bf16.mxu0 %v4199_v34  ;;  %2823 = vmatpush3.bf16.msra.mxu1 %v3155_v12  ;;  %v4235_v12 = vld [vmem:[#allocation10 + $0x10] sm:$0xff]  }
 0x6ad   :  { %2824 = vmatprep.subr.bf16.mxu1 %v3157_v44  ;;  %4669 = vst [vmem:[#allocation47_spill] sm:$0xff] %v4235_v12 }
 0x6af   :  { %2779 = vmatpush3.bf16.msra.mxu0 %v4199_v34  ;;  %v4252_v34 = vld [vmem:[#allocation2 + $0x8] sm:$0xff]  }
 0x6b0   :  { %2780 = vmatprep.subr.bf16.mxu0 %v4203_v40  ;;  %2825 = vmatpush3.bf16.msra.mxu1 %v3157_v44  ;;  %v4239_v44 = vld [vmem:[#allocation10 + $0x18] sm:$0xff]   ;;  %4672 = vst [vmem:[#allocation50_spill] sm:$0xff] %v4252_v34 }
 0x6b1   :  { %2826 = vmatprep.subr.bf16.mxu1 %v3159_v33  ;;  %4670 = vst [vmem:[#allocation48_spill] sm:$0xff] %v4239_v44 }
 0x6b3   :  { %2781 = vmatpush3.bf16.msra.mxu0 %v4203_v40 }
 0x6b4   :  { %2782 = vmatprep.subr.bf16.mxu0 %v4207_v42  ;;  %2827 = vmatpush3.bf16.msra.mxu1 %v3159_v33 }
 0x6b5   :  { %2828 = vmatprep.subr.bf16.mxu1 %v3161_v62 }
 0x6b7   :  { %2783 = vmatpush3.bf16.msra.mxu0 %v4207_v42 }
 0x6b8   :  { %2784 = vmatprep.subr.bf16.mxu0 %v4212_v41  ;;  %2829 = vmatpush3.bf16.msra.mxu1 %v3161_v62 }
 0x6b9   :  { %2834 = vmatprep.subr.bf16.mxu1 %v4228_v63 }
 0x6bb   :  { %2785 = vmatpush3.bf16.msra.mxu0 %v4212_v41  ;;  %2831 = vmatmul.mubr.bf16.vlgmr.msra.gmra.mrb[8].mxu1 %v3847_v26  ;;  %v4244_v26 = vld [vmem:[#allocation10 + $0x20] sm:$0xff]  }
 0x6bc   :  { %2786 = vmatprep.subr.bf16.mxu0 %v4216_v43  ;;  %2835 = vmatpush3.bf16.msra.mxu1 %v4228_v63  ;;  %4671 = vst [vmem:[#allocation49_spill] sm:$0xff] %v4244_v26 }
 0x6bd   :  { %2836 = vmatprep.subr.bf16.mxu1 %v4230_v37 }
 0x6bf   :  { %2787 = vmatpush3.bf16.msra.mxu0 %v4216_v43 }
 0x6c0   :  { %2788 = vmatprep.subr.bf16.mxu0 %v4220_v54  ;;  %2837 = vmatpush3.bf16.msra.mxu1 %v4230_v37 }
 0x6c1   :  { %2838 = vmatprep.subr.bf16.mxu1 %v4235_v12 }
 0x6c3   :  { %2789 = vmatpush3.bf16.msra.mxu0 %v4220_v54 }
 0x6c4   :  { %2794 = vmatprep.subr.bf16.mxu0 %v4224_v55  ;;  %2839 = vmatpush3.bf16.msra.mxu1 %v4235_v12 }
 0x6c5   :  { %2840 = vmatprep.subr.bf16.mxu1 %v4239_v44 }
 0x6c8   :  { %2841 = vmatpush3.bf16.msra.mxu1 %v4239_v44 }
 0x6c9   :  { %2842 = vmatprep.subr.bf16.mxu1 %v4244_v26 }
 0x6cc   :  { %2843 = vmatpush3.bf16.msra.mxu1 %v4244_v26 }
 0x771   :  { %v2766_v62 = vpop.f32.mrb[20].mxu0 }
 0x772   :  { %v1127_v1 = vpop.f32.mrb[21].mxu0 }
 0x773   :  { %v2767_v33 = vpop.f32.mrb[22].mxu0 }
 0x774   :  { %v4248_v37 = vpack.c.bf16 %v2767_v33, %v2766_v62  ;;  %v1130_v63 = vpop.f32.mrb[23].mxu0  ;;  %v4257_v62 = vld [vmem:[#allocation2 + $0x10] sm:$0xff]   ;;  %v3174_v33 = vld [vmem:[%s4555_s12 + $0x18] sm:$0xff]  }
 0x775   :  { %v4250_v54 = vpack.c.bf16 %v1130_v63, %v1127_v1  ;;  %4673 = vst [vmem:[#allocation51_spill] sm:$0xff] %v4257_v62  ;;  %v4261_v63 = vld [vmem:[#allocation2 + $0x18] sm:$0xff]   ;;  %v3173_v1 = vld [vmem:[%s4555_s12 + $0x10] sm:$0xff]  }
 0x776   :  { %4674 = vst [vmem:[#allocation52_spill] sm:$0xff] %v4261_v63 }
 0x779   :  { %v2772_v43 = vpop.f32.mrb[24].mxu0 }
 0x77a   :  { %v1184_v12 = vpop.f32.mrb[25].mxu0 }
 0x77b   :  { %v2773_v41 = vpop.f32.mrb[26].mxu0 }
 0x77c   :  { %v1234_v42 = vpack.c.bf16 %v2773_v41, %v2772_v43  ;;  %v1187_v40 = vpop.f32.mrb[27].mxu0  ;;  %v4273_v41 = vld [vmem:[#allocation2 + $0x30] sm:$0xff]   ;;  %v4277_v43 = vld [vmem:[#allocation2 + $0x38] sm:$0xff]  }
 0x77d   :  { %v1233_v44 = vpack.c.bf16 %v1187_v40, %v1184_v12  ;;  %v4265_v40 = vld [vmem:[#allocation2 + $0x20] sm:$0xff]   ;;  %4677 = vst [vmem:[#allocation55_spill] sm:$0xff] %v4273_v41  ;;  %4678 = vst [vmem:[#allocation56_spill] sm:$0xff] %v4277_v43 }
 0x77e   :  { %4675 = vst [vmem:[#allocation53_spill] sm:$0xff] %v4265_v40  ;;  %v3171_v12 = vld [vmem:[%s4555_s12] sm:$0xff]  }
 0x77f   :  { %2790 = vmatprep.mubr.bf16.mxu0 %v1233_v44  ;;  %v3172_v44 = vld [vmem:[%s4555_s12 + $0x8] sm:$0xff]   ;;  %s3470_s12 = smov [#allocation20]  }
 0x780   :  { %2791 = vmatmul.mubr.bf16.vlgmr.msra.gmra.mrb[28].mxu0 %v1234_v42  ;;  %v4269_v42 = vld [vmem:[#allocation2 + $0x28] sm:$0xff]   ;;  %s2303_s1 = sshll.u32 %s3470_s12, 4  ;;  %s2304_s1 = int_to_ptr.vmem [resolvable:$true] %s2303_s1 }
 0x781   :  { %2795 = vmatpush3.bf16.msra.mxu0 %v4224_v55  ;;  %2810 = vmatprep.mubr.bf16.mxu0 %v4250_v54  ;;  %4676 = vst [vmem:[#allocation54_spill] sm:$0xff] %v4269_v42  ;;  %s3418_s15 = scalar_lea.vmem %s2304_s1, 256  ;;  %p3423_p5 = scmp.lt.s32.totalorder %s2304_s1, %s2304_s1 }
 0x782   :  { %2796 = vmatprep.subr.bf16.mxu0 %v4252_v34  ;;  %p3419_p4 = scmp.ne.s32.totalorder %s2304_s1, %s3418_s15  ;;  %p3424_p6 = scmp.lt.s32.totalorder %s3418_s15, %s3418_s15 }
 0x784   :  { %p3425_p7 = por %p3424_p6, %p3423_p5 }
 0x785   :  { %2797 = vmatpush3.bf16.msra.mxu0 %v4252_v34 }
 0x786   :  { %2798 = vmatprep.subr.bf16.mxu0 %v4257_v62  ;;  %p3426_p8 = pnand %p3425_p7, %p3419_p4 }
 0x789   :  { %2799 = vmatpush3.bf16.msra.mxu0 %v4257_v62 }
 0x78a   :  { %2800 = vmatprep.subr.bf16.mxu0 %v4261_v63 }
 0x78d   :  { %2801 = vmatpush3.bf16.msra.mxu0 %v4261_v63 }
 0x78e   :  { %2802 = vmatprep.subr.bf16.mxu0 %v4265_v40 }
 0x791   :  { %2803 = vmatpush3.bf16.msra.mxu0 %v4265_v40 }
 0x792   :  { %2804 = vmatprep.subr.bf16.mxu0 %v4269_v42 }
 0x795   :  { %2805 = vmatpush3.bf16.msra.mxu0 %v4269_v42 }
 0x796   :  { %2806 = vmatprep.subr.bf16.mxu0 %v4273_v41 }
 0x799   :  { %2807 = vmatpush3.bf16.msra.mxu0 %v4273_v41 }
 0x79a   :  { %2808 = vmatprep.subr.bf16.mxu0 %v4277_v43 }
 0x79d   :  { %2809 = vmatpush3.bf16.msra.mxu0 %v4277_v43 }
 0x79e   :  { %2854 = vmatprep.subr.bf16.mxu0 %v3171_v12 }
 0x7a0   :  { %2811 = vmatmul.mubr.bf16.vlgmr.msra.gmra.mrb[28].mxu0 %v4248_v37 }
 0x7a1   :  { %2855 = vmatpush3.bf16.msra.mxu0 %v3171_v12  ;;  %v4304_v12 = vpop.f32.mrb[8].mxu1 }
 0x7a2   :  { %2856 = vmatprep.subr.bf16.mxu0 %v3172_v44  ;;  %4679 = vst [vmem:[#allocation57_spill] sm:$0xff] %v4304_v12 }
 0x7a5   :  { %2857 = vmatpush3.bf16.msra.mxu0 %v3172_v44  ;;  %v4306_v44 = vpop.f32.mrb[9].mxu1 }
 0x7a6   :  { %2858 = vmatprep.subr.bf16.mxu0 %v3173_v1 }
 0x7a9   :  { %2859 = vmatpush3.bf16.msra.mxu0 %v3173_v1  ;;  %v4308_v1 = vpop.f32.mrb[10].mxu1 }
 0x7aa   :  { %2860 = vmatprep.subr.bf16.mxu0 %v3174_v33 }
 0x7ad   :  { %2861 = vmatpush3.bf16.msra.mxu0 %v3174_v33  ;;  %v4312_v33 = vpop.f32.mrb[11].mxu1 }
 0x7ae   :  { %2862 = vmatprep.subr.bf16.mxu0 %v3815_v19 }
 0x7b1   :  { %2863 = vmatpush3.bf16.msra.mxu0 %v3815_v19  ;;  %v4310_v19 = vld [vmem:[#allocation10 + $0x28] sm:$0xff]  }
 0x7b2   :  { %2864 = vmatprep.subr.bf16.mxu0 %v3820_v20  ;;  %4680 = vst [vmem:[#allocation58_spill] sm:$0xff] %v4310_v19  ;;  %2844 = vmatprep.subr.bf16.mxu1 %v4310_v19 }
 0x7b3   :  { %2845 = vmatpush3.bf16.msra.mxu1 %v4310_v19 }
 0x7b5   :  { %2865 = vmatpush3.bf16.msra.mxu0 %v3820_v20  ;;  %v4316_v20 = vld [vmem:[#allocation10 + $0x30] sm:$0xff]  }
 0x7b6   :  { %2866 = vmatprep.subr.bf16.mxu0 %v3826_v21  ;;  %4681 = vst [vmem:[#allocation59_spill] sm:$0xff] %v4316_v20  ;;  %2846 = vmatprep.subr.bf16.mxu1 %v4316_v20 }
 0x7b7   :  { %2847 = vmatpush3.bf16.msra.mxu1 %v4316_v20 }
 0x7b9   :  { %2867 = vmatpush3.bf16.msra.mxu0 %v3826_v21  ;;  %v4320_v21 = vld [vmem:[#allocation10 + $0x38] sm:$0xff]  }
 0x7ba   :  { %2868 = vmatprep.subr.bf16.mxu0 %v3833_v22  ;;  %4682 = vst [vmem:[#allocation60_spill] sm:$0xff] %v4320_v21  ;;  %2848 = vmatprep.subr.bf16.mxu1 %v4320_v21 }
 0x7bb   :  { %2849 = vmatpush3.bf16.msra.mxu1 %v4320_v21 }
 0x7bc   :  { %2894 = vmatprep.subr.bf16.mxu1 %v3904_v47 }
 0x7bd   :  { %2869 = vmatpush3.bf16.msra.mxu0 %v3833_v22 }
 0x7be   :  { %2874 = vmatprep.subr.bf16.mxu0 %v3843_v25  ;;  %v4325_v25 = vld [vmem:[#allocation8] ss:$0 sm:$0xff] }
 0x873   :  { %v2812_v22 = vpop.f32.mrb[28].mxu0 }
 0x874   :  { %v1544_v43 = vadd.f32 %v4304_v12, %v2812_v22  ;;  %v1414_v41 = vpop.f32.mrb[29].mxu0 }
 0x875   :  { %v1542_v42 = vadd.f32 %v4306_v44, %v1414_v41  ;;  %v2813_v40 = vpop.f32.mrb[30].mxu0 }
 0x876   :  { %v1555_v63 = vadd.f32 %v4325_v25, %v1544_v43  ;;  %v1545_v62 = vadd.f32 %v4308_v1, %v2813_v40  ;;  %v1417_v34 = vpop.f32.mrb[31].mxu0  ;;  %v3175_v40 = vld [vmem:[#allocation13] sm:$0xff]  }
 0x877   :  { %v1553_v20 = vadd.f32 %v4325_v25, %v1542_v42  ;;  %v1543_v21 = vadd.f32 %v4312_v33, %v1417_v34 }
 0x878   :  { %v1556_v19 = vadd.f32 %v4325_v25, %v1545_v62  ;;  %v1559_v55 = vmax.f32 %v1555_v63, 0.0 }
 0x879   :  { %v1554_v26 = vadd.f32 %v4325_v25, %v1543_v21  ;;  %v1557_v22 = vmax.f32 %v1553_v20, 0.0 }
 0x87a   :  { %v1560_v38 = vmax.f32 %v1556_v19, 0.0 }
 0x87b   :  { %v1558_v12 = vmax.f32 %v1554_v26, 0.0 }
 0x87c   :  { %v1578_v0 = vpack.c.bf16 %v1560_v38, %v1559_v55 }
 0x87d   :  { %v1577_v41 = vpack.c.bf16 %v1558_v12, %v1557_v22 }
 0x87f   :  { %2850 = vmatprep.mubr.bf16.mxu1 %v1577_v41 }
 0x880   :  { %2851 = vmatmul.mubr.bf16.vlgmr.msra.gmra.mrb[12].mxu1 %v1578_v0 }
 0x881   :  { %2895 = vmatpush3.bf16.msra.mxu1 %v3904_v47  ;;  %v4351_v47 = vld [vmem:[#allocation11] ss:$0 sm:$0xff] }
 0x882   :  { %2896 = vmatprep.subr.bf16.mxu1 %v3909_v48 }
 0x885   :  { %2897 = vmatpush3.bf16.msra.mxu1 %v3909_v48 }
 0x886   :  { %2898 = vmatprep.subr.bf16.mxu1 %v3917_v49 }
 0x889   :  { %2899 = vmatpush3.bf16.msra.mxu1 %v3917_v49 }
 0x88a   :  { %2900 = vmatprep.subr.bf16.mxu1 %v3924_v50 }
 0x88d   :  { %2901 = vmatpush3.bf16.msra.mxu1 %v3924_v50 }
 0x88e   :  { %2902 = vmatprep.subr.bf16.mxu1 %v3931_v51 }
 0x891   :  { %2903 = vmatpush3.bf16.msra.mxu1 %v3931_v51 }
 0x892   :  { %2904 = vmatprep.subr.bf16.mxu1 %v3938_v52 }
 0x895   :  { %2905 = vmatpush3.bf16.msra.mxu1 %v3938_v52 }
 0x896   :  { %2906 = vmatprep.subr.bf16.mxu1 %v3946_v59 }
 0x899   :  { %2907 = vmatpush3.bf16.msra.mxu1 %v3946_v59 }
 0x89a   :  { %2908 = vmatprep.subr.bf16.mxu1 %v3953_v60 }
 0x89d   :  { %2909 = vmatpush3.bf16.msra.mxu1 %v3953_v60 }
 0x89e   :  { %2914 = vmatprep.subr.bf16.mxu1 %v4656_v58 }
 0x953   :  { %v2852_v48 = vpop.f32.mrb[12].mxu1 }
 0x954   :  { %v1677_v49 = vadd.f32 %v2852_v48, %v4351_v47  ;;  %v1668_v50 = vpop.f32.mrb[13].mxu1 }
 0x955   :  { %v1669_v51 = vadd.f32 %v4351_v47, %v1668_v50  ;;  %v2853_v0 = vpop.f32.mrb[14].mxu1 }
 0x956   :  { %v1680_v52 = vadd.f32 %v2853_v0, %v4351_v47  ;;  %v1671_v38 = vpop.f32.mrb[15].mxu1  ;;  %v1685_v34 = vmax.f32 %v1677_v49, 0.0 }
 0x957   :  { %v1672_v59 = vadd.f32 %v4351_v47, %v1671_v38  ;;  %v1683_v26 = vmax.f32 %v1669_v51, 0.0 }
 0x958   :  { %v1686_v55 = vmax.f32 %v1680_v52, 0.0 }
 0x959   :  { %v1684_v60 = vmax.f32 %v1672_v59, 0.0 }
 0x95a   :  { %v1688_v62 = vpack.c.bf16 %v1686_v55, %v1685_v34 }
 0x95b   :  { %v1687_v63 = vpack.c.bf16 %v1684_v60, %v1683_v26  ;;  %v4689_v60 = vld [vmem:[#allocation38_spill] sm:$0xff] }
 0x95d   :  { %2870 = vmatprep.mubr.bf16.mxu0 %v1687_v63  ;;  %v4691_v63 = vld [vmem:[#allocation40_spill] sm:$0xff] }
 0x95e   :  { %2871 = vmatmul.mubr.bf16.vlgmr.msra.gmra.mrb[32].mxu0 %v1688_v62  ;;  %v4690_v62 = vld [vmem:[#allocation39_spill] sm:$0xff] }
 0x95f   :  { %2875 = vmatpush3.bf16.msra.mxu0 %v3175_v40  ;;  %2890 = vmatprep.mubr.bf16.mxu0 %v4250_v54  ;;  %v4692_v40 = vld [vmem:[#allocation41_spill] sm:$0xff] }
 0x960   :  { %2876 = vmatprep.subr.bf16.mxu0 %v3849_v27 }
 0x963   :  { %2877 = vmatpush3.bf16.msra.mxu0 %v3849_v27 }
 0x964   :  { %2878 = vmatprep.subr.bf16.mxu0 %v3854_v28 }
 0x967   :  { %2879 = vmatpush3.bf16.msra.mxu0 %v3854_v28 }
 0x968   :  { %2880 = vmatprep.subr.bf16.mxu0 %v3858_v29 }
 0x96b   :  { %2881 = vmatpush3.bf16.msra.mxu0 %v3858_v29 }
 0x96c   :  { %2882 = vmatprep.subr.bf16.mxu0 %v3862_v30 }
 0x96f   :  { %2883 = vmatpush3.bf16.msra.mxu0 %v3862_v30 }
 0x970   :  { %2884 = vmatprep.subr.bf16.mxu0 %v3868_v31 }
 0x973   :  { %2885 = vmatpush3.bf16.msra.mxu0 %v3868_v31 }
 0x974   :  { %2886 = vmatprep.subr.bf16.mxu0 %v3872_v32 }
 0x977   :  { %2887 = vmatpush3.bf16.msra.mxu0 %v3872_v32 }
 0x978   :  { %2888 = vmatprep.subr.bf16.mxu0 %v3896_v46 }
 0x97b   :  { %2889 = vmatpush3.bf16.msra.mxu0 %v3896_v46 }
 0x97c   :  { %2942 = vmatprep.subr.bf16.mxu0 %v4656_v58 }
 0x97e   :  { %2891 = vmatmul.mubr.bf16.vlgmr.msra.gmra.mrb[32].mxu0 %v4248_v37 }
 0x97f   :  { %2943 = vmatpush3.bf16.msra.mxu0 %v3971_v13  ;;  %2958 = vmatprep.mubr.msk.bf16.mxu0 %vm3469_vm5, %v4656_v58 }
 0x980   :  { %2944 = vmatprep.subr.bf16.mxu0 %v4656_v58 }
 0x983   :  { %2945 = vmatpush3.bf16.msra.mxu0 %v3977_v14 }
 0x984   :  { %2946 = vmatprep.subr.bf16.mxu0 %v4656_v58 }
 0x987   :  { %2947 = vmatpush3.bf16.msra.mxu0 %v3984_v15 }
 0x988   :  { %2948 = vmatprep.subr.bf16.mxu0 %v4656_v58 }
 0x98b   :  { %2949 = vmatpush3.bf16.msra.mxu0 %v3991_v16 }
 0x98c   :  { %2950 = vmatprep.subr.bf16.mxu0 %v4656_v58 }
 0x98f   :  { %2951 = vmatpush3.bf16.msra.mxu0 %v3998_v18 }
 0x990   :  { %2952 = vmatprep.subr.bf16.mxu0 %v4656_v58 }
 0x993   :  { %2953 = vmatpush3.bf16.msra.mxu0 %v4005_v23 }
 0x994   :  { %2954 = vmatprep.subr.bf16.mxu0 %v4656_v58 }
 0x997   :  { %2955 = vmatpush3.bf16.msra.mxu0 %v4012_v24 }
 0x998   :  { %2956 = vmatprep.subr.bf16.mxu0 %v4656_v58 }
 0x99b   :  { %2957 = vmatpush3.bf16.msra.mxu0 %v4019_v35 }
 0x99e   :  { %2959 = vmatmul.mubr.bf16.vlgmr.msra.gmra.mrb[36].mxu0 %v4170_v39 }
 0x99f   :  { %2984 = vmatprep.mubr.msk.bf16.mxu0 %vm280_vm4, %v3890_v45 }
 0xa51   :  { %v2892_v27 = vpop.f32.mrb[32].mxu0 }
 0xa52   :  { %v1789_v28 = vadd.f32 %v2892_v27, %v3958_v61  ;;  %v1772_v29 = vpop.f32.mrb[33].mxu0  ;;  %v4694_v27 = vld [vmem:[#allocation43_spill] sm:$0xff] }
 0xa53   :  { %v1787_v30 = vadd.f32 %v3958_v61, %v1772_v29  ;;  %v2893_v31 = vpop.f32.mrb[34].mxu0 }
 0xa54   :  { %v1790_v32 = vadd.f32 %v2893_v31, %v3958_v61  ;;  %v1775_v46 = vpop.f32.mrb[35].mxu0  ;;  %v1793_v14 = vmax.f32 %v1789_v28, 0.0  ;;  %v4695_v28 = vld [vmem:[#allocation44_spill] sm:$0xff] }
 0xa55   :  { %v1788_v13 = vadd.f32 %v3958_v61, %v1775_v46  ;;  %v1791_v16 = vmax.f32 %v1787_v30, 0.0  ;;  %v4696_v30 = vld [vmem:[#allocation34_spill] sm:$0xff] }
 0xa56   :  { %v1794_v15 = vmax.f32 %v1790_v32, 0.0 }
 0xa57   :  { %v1792_v18 = vmax.f32 %v1788_v13, 0.0 }
 0xa58   :  { %v1796_v23 = vpack.c.bf16 %v1794_v15, %v1793_v14 }
 0xa59   :  { %v1795_v24 = vpack.c.bf16 %v1792_v18, %v1791_v16 }
 0xa5b   :  { %2910 = vmatprep.mubr.bf16.mxu1 %v1795_v24  ;;  %v4698_v24 = vld [vmem:[#allocation35_spill] sm:$0xff] }
 0xa5c   :  { %2911 = vmatmul.mubr.bf16.vlgmr.msra.gmra.mrb[16].mxu1 %v1796_v23  ;;  %v4697_v23 = vld [vmem:[#allocation28_spill] sm:$0xff] }
 0xa5d   :  { %2918 = vmatprep.mubr.msk.bf16.mxu1 %vm3469_vm5, %v4656_v58 }
 0xa71   :  { %v4400_v45 = vpop.f32.mrb[36].mxu0 }
 0xa72   :  { %v2960_v35 = vpop.f32.mrb[37].mxu0 }
 0xa73   :  { %v4402_v39 = vpop.f32.mrb[38].mxu0  ;;  %v4700_v35 = vld [vmem:[#allocation36_spill] sm:$0xff] }
 0xa74   :  { %v2961_v54 = vpop.f32.mrb[39].mxu0 }
 0xa75   :  { %v4702_v54 = vld [vmem:[#allocation47_spill] sm:$0xff] }
 0xb2f   :  { %v2912_v37 = vpop.f32.mrb[16].mxu1 }
 0xb30   :  { %v1840_v61 = vadd.f32 %v2912_v37, %v4025_v36  ;;  %v1831_v42 = vpop.f32.mrb[17].mxu1  ;;  %v4703_v37 = vld [vmem:[#allocation48_spill] sm:$0xff] }
 0xb31   :  { %v1832_v43 = vadd.f32 %v4025_v36, %v1831_v42  ;;  %v2913_v12 = vpop.f32.mrb[18].mxu1  ;;  %v4705_v42 = vld [vmem:[#allocation58_spill] sm:$0xff] }
 0xb32   :  { %v1843_v19 = vadd.f32 %v2913_v12, %v4025_v36  ;;  %v1834_v20 = vpop.f32.mrb[19].mxu1  ;;  %v1848_v22 = vmax.f32 %v1840_v61, 0.0  ;;  %v4704_v61 = vld [vmem:[#allocation49_spill] sm:$0xff]  ;;  %v4707_v12 = vld [vmem:[#allocation60_spill] sm:$0xff] }
 0xb33   :  { %v1835_v21 = vadd.f32 %v4025_v36, %v1834_v20  ;;  %v1846_v48 = vmax.f32 %v1832_v43, 0.0  ;;  %v4706_v43 = vld [vmem:[#allocation59_spill] sm:$0xff] }
 0xb34   :  { %v1849_v41 = vmax.f32 %v1843_v19, 0.0 }
 0xb35   :  { %v1847_v49 = vmax.f32 %v1835_v21, 0.0 }
 0xb36   :  { %v1851_v50 = vpack.c.bf16 %v1849_v41, %v1848_v22 }
 0xb37   :  { %v1850_v51 = vpack.c.bf16 %v1847_v49, %v1846_v48 }
 0xb39   :  { %2915 = vmatpush3.bf16.msra.mxu1 %v1850_v51 }
 0xb3a   :  { %2916 = vmatprep.subr.bf16.mxu1 %v4656_v58 }
 0xb3d   :  { %2917 = vmatpush3.bf16.msra.mxu1 %v1851_v50 }
 0xb3e   :  { %2922 = vmatprep.subr.bf16.mxu1 %v4656_v58 }
 0xb40   :  { %2919 = vmatmul.mubr.msk.bf16.vlgmr.msra.gmra.mrb[20].mxu1 %vm710_vm8, %v4038_v2 }
 0xb41   :  { %2923 = vmatpush3.bf16.msra.mxu1 %v4043_v3  ;;  %2938 = vmatprep.mubr.msk.bf16.mxu1 %vm3469_vm5, %v4656_v58 }
 0xb42   :  { %2924 = vmatprep.subr.bf16.mxu1 %v4656_v58 }
 0xb45   :  { %2925 = vmatpush3.bf16.msra.mxu1 %v4052_v4 }
 0xb46   :  { %2926 = vmatprep.subr.bf16.mxu1 %v4656_v58 }
 0xb49   :  { %2927 = vmatpush3.bf16.msra.mxu1 %v4061_v5 }
 0xb4a   :  { %2928 = vmatprep.subr.bf16.mxu1 %v4656_v58 }
 0xb4d   :  { %2929 = vmatpush3.bf16.msra.mxu1 %v4068_v6  ;;  %v4683_v6 = vld [vmem:[#allocation29_spill] sm:$0xff] }
 0xb4e   :  { %2930 = vmatprep.subr.bf16.mxu1 %v4656_v58 }
 0xb51   :  { %2931 = vmatpush3.bf16.msra.mxu1 %v4075_v7  ;;  %v4684_v7 = vld [vmem:[#allocation30_spill] sm:$0xff] }
 0xb52   :  { %2932 = vmatprep.subr.bf16.mxu1 %v4656_v58 }
 0xb55   :  { %2933 = vmatpush3.bf16.msra.mxu1 %v4082_v8  ;;  %v4685_v8 = vld [vmem:[#allocation31_spill] sm:$0xff] }
 0xb56   :  { %2934 = vmatprep.subr.bf16.mxu1 %v4656_v58 }
 0xb59   :  { %2935 = vmatpush3.bf16.msra.mxu1 %v4089_v10  ;;  %v4686_v10 = vld [vmem:[#allocation32_spill] sm:$0xff] }
 0xb5a   :  { %2936 = vmatprep.subr.bf16.mxu1 %v4656_v58 }
 0xb5d   :  { %2937 = vmatpush3.bf16.msra.mxu1 %v4097_v11 }
 0xb5e   :  { %2962 = vmatprep.subr.bf16.mxu1 %v4656_v58 }
 0xc13   :  { %v1886_v36 = vpop.f32.mrb[20].mxu1 }
 0xc14   :  { %v2920_v2 = vpop.f32.mrb[21].mxu1 }
 0xc15   :  { %v1889_v3 = vpop.f32.mrb[22].mxu1 }
 0xc16   :  { %v1893_v4 = vpack.c.bf16 %v1889_v3, %v1886_v36  ;;  %v2921_v5 = vpop.f32.mrb[23].mxu1 }
 0xc17   :  { %v4709_v5 = vld [vmem:[#allocation51_spill] sm:$0xff] }
 0xc18   :  { %2939 = vmatmul.mubr.bf16.vlgmr.msra.gmra.mrb[24].mxu1 %v1893_v4  ;;  %v4708_v4 = vld [vmem:[#allocation50_spill] sm:$0xff] }
 0xc19   :  { %2963 = vmatpush3.bf16.msra.mxu1 %v4104_v53  ;;  %2978 = vmatprep.mubr.msk.bf16.mxu1 %vm3469_vm5, %v4656_v58 }
 0xc1a   :  { %2964 = vmatprep.subr.bf16.mxu1 %v4656_v58 }
 0xc1d   :  { %2965 = vmatpush3.bf16.msra.mxu1 %v4110_v56 }
 0xc1e   :  { %2966 = vmatprep.subr.bf16.mxu1 %v4656_v58 }
 0xc21   :  { %2967 = vmatpush3.bf16.msra.mxu1 %v4119_v9 }
 0xc22   :  { %2968 = vmatprep.subr.bf16.mxu1 %v4656_v58 }
 0xc25   :  { %2969 = vmatpush3.bf16.msra.mxu1 %v4126_v17  ;;  %v4687_v17 = vld [vmem:[#allocation33_spill] sm:$0xff] }
 0xc26   :  { %2970 = vmatprep.subr.bf16.mxu1 %v4656_v58 }
 0xc29   :  { %2971 = vmatpush3.bf16.msra.mxu1 %v4683_v6  ;;  %v4710_v6 = vld [vmem:[#allocation52_spill] sm:$0xff] }
 0xc2a   :  { %2972 = vmatprep.subr.bf16.mxu1 %v4656_v58 }
 0xc2d   :  { %2973 = vmatpush3.bf16.msra.mxu1 %v4684_v7  ;;  %v4711_v7 = vld [vmem:[#allocation53_spill] sm:$0xff] }
 0xc2e   :  { %2974 = vmatprep.subr.bf16.mxu1 %v4656_v58 }
 0xc31   :  { %2975 = vmatpush3.bf16.msra.mxu1 %v4685_v8  ;;  %v4712_v8 = vld [vmem:[#allocation54_spill] sm:$0xff] }
 0xc32   :  { %2976 = vmatprep.subr.bf16.mxu1 %v4656_v58  ;;  %v4688_v58 = vld [vmem:[#allocation37_spill] sm:$0xff] }
 0xc35   :  { %2977 = vmatpush3.bf16.msra.mxu1 %v4686_v10  ;;  %v4713_v10 = vld [vmem:[#allocation55_spill] sm:$0xff] }
 0xc36   :  { %2994 = vmatprep.subr.bf16.mxu1 %v4177_v57 }
 0xceb   :  { %v1928_v11 = vpop.f32.mrb[24].mxu1 }
 0xcec   :  { %v1970_v53 = vadd.f32 %v4400_v45, %v1928_v11  ;;  %v2940_v56 = vpop.f32.mrb[25].mxu1  ;;  %v4699_v45 = vld [vmem:[#allocation45_spill] sm:$0xff]  ;;  %v4714_v11 = vld [vmem:[#allocation56_spill] sm:$0xff] }
 0xced   :  { %v1931_v9 = vpop.f32.mrb[26].mxu1  ;;  %v4715_v56 = vld [vmem:[#allocation57_spill] sm:$0xff] }
 0xcee   :  { %v1976_v0 = vadd.f32 %v4687_v17, %v1970_v53  ;;  %v1973_v52 = vadd.f32 %v4402_v39, %v1931_v9  ;;  %v2941_v38 = vpop.f32.mrb[27].mxu1  ;;  %v4701_v39 = vld [vmem:[#allocation46_spill] sm:$0xff] }
 0xcf0   :  { %v1977_v59 = vadd.f32 %v4687_v17, %v1973_v52  ;;  %v1978_v34 = vmax.f32 %v1976_v0, 0.0 }
 0xcf2   :  { %v1979_v55 = vmax.f32 %v1977_v59, 0.0 }
 0xcf4   :  { %v1980_v26 = vpack.c.bf16 %v1979_v55, %v1978_v34 }
 0xcf6   :  { %2979 = vmatmul.mubr.bf16.vlgmr.msra.gmra.mrb[28].mxu1 %v1980_v26 }
 0xcf7   :  { %2995 = vmatpush3.bf16.msra.mxu1 %v4177_v57  ;;  %v4693_v57 = vld [vmem:[#allocation42_spill] sm:$0xff] }
 0xcf8   :  { %2996 = vmatprep.subr.bf16.mxu1 %v4688_v58 }
 0xcfb   :  { %2997 = vmatpush3.bf16.msra.mxu1 %v4688_v58 }
 0xcfc   :  { %2998 = vmatprep.subr.bf16.mxu1 %v4689_v60 }
 0xcff   :  { %2999 = vmatpush3.bf16.msra.mxu1 %v4689_v60 }
 0xd00   :  { %3000 = vmatprep.subr.bf16.mxu1 %v4690_v62 }
 0xd03   :  { %3001 = vmatpush3.bf16.msra.mxu1 %v4690_v62 }
 0xd04   :  { %3002 = vmatprep.subr.bf16.mxu1 %v4691_v63 }
 0xd07   :  { %3003 = vmatpush3.bf16.msra.mxu1 %v4691_v63 }
 0xd08   :  { %3004 = vmatprep.subr.bf16.mxu1 %v4692_v40 }
 0xd0b   :  { %3005 = vmatpush3.bf16.msra.mxu1 %v4692_v40 }
 0xd0c   :  { %3006 = vmatprep.subr.bf16.mxu1 %v4693_v57 }
 0xd0f   :  { %3007 = vmatpush3.bf16.msra.mxu1 %v4693_v57 }
 0xd10   :  { %3008 = vmatprep.subr.bf16.mxu1 %v4694_v27 }
 0xd13   :  { %3009 = vmatpush3.bf16.msra.mxu1 %v4694_v27 }
 0xd14   :  { %3014 = vmatprep.subr.bf16.mxu1 %v4695_v28 }
 0xdc9   :  { %v2015_v29 = vpop.f32.mrb[28].mxu1 }
 0xdca   :  { %v2016_v31 = vadd.f32 %v4696_v30, %v2015_v29  ;;  %v2980_v32 = vpop.f32.mrb[29].mxu1 }
 0xdcb   :  { %v2018_v46 = vpop.f32.mrb[30].mxu1 }
 0xdcc   :  { %v2022_v13 = vmax.f32 %v2016_v31, 0.0  ;;  %v2019_v14 = vadd.f32 %v4696_v30, %v2018_v46  ;;  %v2981_v15 = vpop.f32.mrb[31].mxu1 }
 0xdce   :  { %2292 = vst [vmem:[#allocation20] sm:$0xff] %v2022_v13  ;;  %v2023_v16 = vmax.f32 %v2019_v14, 0.0 }
 0xdd0   :  { %v2024_v18 = vpack.c.bf16 %v2023_v16, %v2022_v13  ;;  %2293 = vst [vmem:[#allocation20 + $0x8] sm:$0xff] %v2023_v16 }
 0xdd2   :  { %2982 = vmatprep.subr.bf16.mxu0 %v2024_v18 }
 0xdd3   :  { %2983 = vmatpush3.bf16.msra.mxu0 %v2024_v18 }
 0xdd4   :  { %2988 = vmatprep.subr.bf16.mxu0 %v2024_v18 }
 0xdd6   :  { %2985 = vmatmul.mubr.msk.bf16.vlgmr.msra.gmra.mrb[40].mxu0 %vm280_vm4, %v4697_v23 }
 0xdd7   :  { %2989 = vmatpush3.bf16.msra.mxu0 %v2024_v18  ;;  %2990 = vmatprep.mubr.msk.bf16.mxu0 %vm280_vm4, %v4698_v24 }
 0xdd8   :  { %3034 = vmatprep.subr.bf16.mxu0 %v4699_v45 }
 0xdde   :  { %2991 = vmatmul.mubr.msk.bf16.vlgmr.msra.gmra.mrb[44].mxu0 %vm280_vm4, %v4700_v35 }
 0xddf   :  { %3035 = vmatpush3.bf16.msra.mxu0 %v4699_v45 }
 0xde0   :  { %3036 = vmatprep.subr.bf16.mxu0 %v4701_v39 }
 0xde3   :  { %3037 = vmatpush3.bf16.msra.mxu0 %v4701_v39 }
 0xde4   :  { %3038 = vmatprep.subr.bf16.mxu0 %v4702_v54 }
 0xde7   :  { %3039 = vmatpush3.bf16.msra.mxu0 %v4702_v54 }
 0xde8   :  { %3040 = vmatprep.subr.bf16.mxu0 %v4703_v37 }
 0xdeb   :  { %3041 = vmatpush3.bf16.msra.mxu0 %v4703_v37 }
 0xdec   :  { %3042 = vmatprep.subr.bf16.mxu0 %v4704_v61 }
 0xdef   :  { %3043 = vmatpush3.bf16.msra.mxu0 %v4704_v61 }
 0xdf0   :  { %3044 = vmatprep.subr.bf16.mxu0 %v4705_v42 }
 0xdf3   :  { %3045 = vmatpush3.bf16.msra.mxu0 %v4705_v42 }
 0xdf4   :  { %3046 = vmatprep.subr.bf16.mxu0 %v4706_v43 }
 0xdf7   :  { %3047 = vmatpush3.bf16.msra.mxu0 %v4706_v43 }
 0xdf8   :  { %3048 = vmatprep.subr.bf16.mxu0 %v4707_v12 }
 0xdfb   :  { %3049 = vmatpush3.bf16.msra.mxu0 %v4707_v12 }
 0xea9   :  { %v2986_v19 = vpop.f32.mrb[40].mxu0 }
 0xeaa   :  { %v2059_v20 = vpop.f32.mrb[41].mxu0 }
 0xeab   :  { %v2987_v21 = vpop.f32.mrb[42].mxu0 }
 0xeac   :  { %v2124_v22 = vpack.c.bf16 %v2987_v21, %v2986_v19  ;;  %v2062_v41 = vpop.f32.mrb[43].mxu0 }
 0xead   :  { %v2123_v48 = vpack.c.bf16 %v2062_v41, %v2059_v20 }
 0xeb1   :  { %v2992_v49 = vpop.f32.mrb[44].mxu0 }
 0xeb2   :  { %v2108_v50 = vpop.f32.mrb[45].mxu0 }
 0xeb3   :  { %v2993_v51 = vpop.f32.mrb[46].mxu0 }
 0xeb4   :  { %v2126_v36 = vpack.c.bf16 %v2993_v51, %v2992_v49  ;;  %v2111_v2 = vpop.f32.mrb[47].mxu0 }
 0xeb5   :  { %v2125_v3 = vpack.c.bf16 %v2111_v2, %v2108_v50 }
 0xeb7   :  { %3010 = vmatprep.mubr.bf16.mxu1 %v2125_v3 }
 0xeb8   :  { %3011 = vmatmul.mubr.bf16.vlgmr.msra.gmra.mrb[32].mxu1 %v2126_v36 }
 0xeb9   :  { %3015 = vmatpush3.bf16.msra.mxu1 %v4695_v28  ;;  %3030 = vmatprep.mubr.bf16.mxu1 %v2123_v48 }
 0xeba   :  { %3016 = vmatprep.subr.bf16.mxu1 %v4708_v4 }
 0xebd   :  { %3017 = vmatpush3.bf16.msra.mxu1 %v4708_v4 }
 0xebe   :  { %3018 = vmatprep.subr.bf16.mxu1 %v4709_v5 }
 0xec1   :  { %3019 = vmatpush3.bf16.msra.mxu1 %v4709_v5 }
 0xec2   :  { %3020 = vmatprep.subr.bf16.mxu1 %v4710_v6 }
 0xec5   :  { %3021 = vmatpush3.bf16.msra.mxu1 %v4710_v6 }
 0xec6   :  { %3022 = vmatprep.subr.bf16.mxu1 %v4711_v7 }
 0xec9   :  { %3023 = vmatpush3.bf16.msra.mxu1 %v4711_v7 }
 0xeca   :  { %3024 = vmatprep.subr.bf16.mxu1 %v4712_v8 }
 0xecd   :  { %3025 = vmatpush3.bf16.msra.mxu1 %v4712_v8 }
 0xece   :  { %3026 = vmatprep.subr.bf16.mxu1 %v4713_v10 }
 0xed1   :  { %3027 = vmatpush3.bf16.msra.mxu1 %v4713_v10 }
 0xed2   :  { %3028 = vmatprep.subr.bf16.mxu1 %v4714_v11 }
 0xed5   :  { %3029 = vmatpush3.bf16.msra.mxu1 %v4714_v11 }
 0xed8   :  { %3031 = vmatmul.mubr.bf16.vlgmr.msra.gmra.mrb[32].mxu1 %v2124_v22 }
 0xfab   :  { %v3032_v53 = vpop.f32.mrb[32].mxu1 }
 0xfac   :  { %v2227_v9 = vadd.f32 %v3032_v53, %v4715_v56  ;;  %v2210_v17 = vpop.f32.mrb[33].mxu1 }
 0xfad   :  { %v2225_v0 = vadd.f32 %v2210_v17, %v4306_v44  ;;  %v3033_v52 = vpop.f32.mrb[34].mxu1 }
 0xfae   :  { %v2231_v38 = vadd.f32 %v4325_v25, %v2227_v9  ;;  %v2228_v59 = vadd.f32 %v3033_v52, %v4308_v1  ;;  %v2213_v34 = vpop.f32.mrb[35].mxu1 }
 0xfaf   :  { %v2229_v55 = vadd.f32 %v4325_v25, %v2225_v0  ;;  %v2226_v26 = vadd.f32 %v2213_v34, %v4312_v33 }
 0xfb0   :  { %v2232_v58 = vadd.f32 %v4325_v25, %v2228_v59  ;;  %v2235_v62 = vmax.f32 %v2231_v38, 0.0 }
 0xfb1   :  { %v2230_v60 = vadd.f32 %v4325_v25, %v2226_v26  ;;  %v2233_v40 = vmax.f32 %v2229_v55, 0.0 }
 0xfb2   :  { %v2236_v63 = vmax.f32 %v2232_v58, 0.0 }
 0xfb3   :  { %v2234_v57 = vmax.f32 %v2230_v60, 0.0 }
 0xfb4   :  { %v2238_v27 = vpack.c.bf16 %v2236_v63, %v2235_v62 }
 0xfb5   :  { %v2237_v44 = vpack.c.bf16 %v2234_v57, %v2233_v40 }
 0xfb7   :  { %3050 = vmatprep.mubr.bf16.mxu0 %v2237_v44 }
 0xfb8   :  { %3051 = vmatmul.mubr.bf16.vlgmr.msra.gmra.mrb[48].mxu0 %v2238_v27 }
 0xfb9   :  { %3429 = shalt.err (!%p3426_p8)
}
 0xfba   :  { %s3430_s10 = scalar_lea.hbm %s4564_s21, 256 }
 0xfbb   :  { %p3431_p9 = scmp.ne.s32.totalorder %s4564_s21, %s3430_s10  ;;  %p3434_p10 = scmp.lt.u32.totalorder %s3430_s10, %s4564_s21 }
 0xfbd   :  { %p3436_p11 = pnand %p3434_p10, %p3431_p9 }
 0xfbf   :  { %3439 = shalt.err (!%p3436_p11)
}
 0xfc0   :  { %s3471_s13 = smov 128   ;;  %s3472_s23 = smov 8  }
 0xfc1   :  { %2309 = dma.vmem_to_hbm [thread:$0]  %s2304_s1, 256, %s4564_s21, [#allocation4], %s3471_s13, %s3471_s13, %s3472_s23  }
0x108b   :  { %v3052_v1 = vpop.f32.mrb[48].mxu0 }
0x108c   :  { %v2282_v33 = vadd.f32 %v3052_v1, %v4351_v47  ;;  %v2273_v25 = vpop.f32.mrb[49].mxu0 }
0x108d   :  { %v2274_v28 = vadd.f32 %v4351_v47, %v2273_v25  ;;  %v3053_v29 = vpop.f32.mrb[50].mxu0 }
0x108e   :  { %v2290_v30 = vmax.f32 %v2282_v33, 0.0  ;;  %v2285_v31 = vadd.f32 %v3053_v29, %v4351_v47  ;;  %v2276_v32 = vpop.f32.mrb[51].mxu0 }
0x108f   :  { %v2288_v46 = vmax.f32 %v2274_v28, 0.0  ;;  %v2277_v13 = vadd.f32 %v4351_v47, %v2276_v32 }
0x1090   :  { %2296 = vst [vmem:[%s4565_s22 + $0x10] sm:$0xff] %v2290_v30  ;;  %v2291_v14 = vmax.f32 %v2285_v31, 0.0 }
0x1091   :  { %2294 = vst [vmem:[%s4565_s22] sm:$0xff] %v2288_v46  ;;  %v2289_v15 = vmax.f32 %v2277_v13, 0.0 }
0x1092   :  { %2297 = vst [vmem:[%s4565_s22 + $0x18] sm:$0xff] %v2291_v14 }
0x1093   :  { %2295 = vst [vmem:[%s4565_s22 + $0x8] sm:$0xff] %v2289_v15 }
0x1094   :  { %3452 = dma.done.wait [#allocation4], 256  }
0x1095   :  { %3453 = vsyncadd [#allocation4], 4294967040 }
0x1096   :  { %2317 = vsyncpa [#allocation3], 1 }
0x1097   :  { %2318 = vsyncpa [#allocation6], 1 }
0x1098   :  { %2319 = vsyncpa [#allocation9], 1 }
0x1099   :  { %2320 = vsyncpa [#allocation12], 1 }
0x109a   :  { %2321 = vsyncpa [#allocation15], 1 }
0x109b   :  { %2322 = vsyncpa [#allocation18], 1 }
0x109c   :  { %2323 = vsyncpa [#allocation4], 1 }

</bundles_post_ra>
